<compile_context>
chip_gen: v7x
topology: tpu7x:2x2x1
jax: 0.10.0
libtpu: 0.0.40
codegen_flags: <defaults>
</compile_context>

<pallas_src>
import functools

import jax
import jax.numpy as jnp
from jax.experimental import pallas as pl
from jax.experimental.pallas import tpu as pltpu


_MIN_ROWS_FOR_PALLAS = 128   # below this many output rows, XLA is faster


def _round_up(x, m):
    return ((x + m - 1) // m) * m


# ---------------------------------------------------------------------------
# Tile / padding selection.
#   * _kn_padding(K, N) is used once at weight-preparation time.
#   * _kn_tiles(Kp, Np) re-derives the SAME tiles from the padded shapes at
#     call time (so no static ints need to live in the param pytree).
# ---------------------------------------------------------------------------
def _kn_padding(K, N):
    Kp = _round_up(K, 128)
    if Kp > 1024:
        kp512, kp1024 = _round_up(K, 512), _round_up(K, 1024)
        Kp = kp512 if kp512 < kp1024 else kp1024   # minimal padding, prefer 1024
    Np = _round_up(N, 128)
    if Np > 512:
        Np = _round_up(N, 512)
    return Kp, Np


def _kn_tiles(Kp, Np):
    tk = Kp if Kp <= 1024 else (1024 if Kp % 1024 == 0 else 512)
    tn = Np if Np <= 512 else 512
    return tk, tn


def _m_tiles(M):
    Mp = max(_round_up(M, 16), 16)          # bf16 sublane packing
    if Mp <= 512:
        return Mp, Mp                       # single row tile
    tm = 512 if Mp % 512 == 0 else 256
    return _round_up(Mp, tm), tm


# ---------------------------------------------------------------------------
# Pallas kernel: out[m,n] = act(sum_k A[m,k] @ W[k,n] + b[n])
# Grid = (M tiles [parallel], N tiles [parallel], K tiles [reduction, inner]).
# The f32 output block doubles as the accumulator (constant index along K).
# ---------------------------------------------------------------------------
def _mm_kernel(a_ref, w_ref, b_ref, o_ref, *, relu):
    k = pl.program_id(2)

    @pl.when(k == 0)
    def _():
        o_ref[...] = jnp.zeros_like(o_ref)

    o_ref[...] += jnp.dot(a_ref[...], w_ref[...],
                          preferred_element_type=jnp.float32)

    @pl.when(k == pl.num_programs(2) - 1)
    def _():
        out = o_ref[...] + b_ref[...]
        if relu:
            out = jnp.maximum(out, 0.0)
        o_ref[...] = out


def matmul_bias_act(a, layer, relu):
    """act(a @ W + b).

    layer["w"]: bf16 (Kp, Np) pre-padded weight for Pallas layers,
                f32 (K, N) for tiny (bypass) layers.
    layer["b"]: f32 (N,) unpadded bias.
    a: (M, K') activations; K' may already equal Kp (im2col folds the pad in).
    Returns f32 (M, N).
    """
    w, b = layer["w"], layer["b"]
    M = a.shape[0]
    Nout = b.shape[0]
    is_pallas_layer = (w.dtype == jnp.bfloat16)

    # Match A's reduction width to the (possibly padded) weight rows.
    if a.shape[1] < w.shape[0]:
        a = jnp.pad(a, ((0, 0), (0, w.shape[0] - a.shape[1])))

    # Tiny layers (1x1 heads N=6/2, level-0 convs N=12, first conv K=9) and
    # tiny-row problems: padding them into 128-wide MXU problems is pure
    # overhead, let XLA handle them directly.
    if (not is_pallas_layer) or M < _MIN_ROWS_FOR_PALLAS:
        out = jnp.dot(a, w, preferred_element_type=jnp.float32)
        out = out[:, :Nout] if out.shape[1] != Nout else out
        out = out + b
        if relu:
            out = jnp.maximum(out, 0.0)
        return out

    Kp, Np = w.shape
    tk, tn = _kn_tiles(Kp, Np)
    Mp, tm = _m_tiles(M)

    a = a.astype(jnp.bfloat16)
    if Mp > M:
        a = jnp.pad(a, ((0, Mp - M), (0, 0)))
    bp = jnp.pad(b.reshape(1, Nout).astype(jnp.float32),
                 ((0, 0), (0, Np - Nout)))

    out = pl.pallas_call(
        functools.partial(_mm_kernel, relu=relu),
        out_shape=jax.ShapeDtypeStruct((Mp, Np), jnp.float32),
        grid_spec=pltpu.PrefetchScalarGridSpec(
            num_scalar_prefetch=0,
            grid=(Mp // tm, Np // tn, Kp // tk),
            in_specs=[
                pl.BlockSpec((tm, tk), lambda m, n, k: (m, k)),
                pl.BlockSpec((tk, tn), lambda m, n, k: (k, n)),
                pl.BlockSpec((1, tn), lambda m, n, k: (0, n)),
            ],
            out_specs=pl.BlockSpec((tm, tn), lambda m, n, k: (m, n)),
        ),
        compiler_params=pltpu.CompilerParams(
            dimension_semantics=("parallel", "parallel", "arbitrary"),
            vmem_limit_bytes=32 * 1024 * 1024),
    )(a, w, bp)
    return out[:M, :Nout]


# ---------------------------------------------------------------------------
# Conv / pool / upsample building blocks (NHWC)
# ---------------------------------------------------------------------------
def conv3x3_same(x, layer, relu=True):
    """3x3 conv, padding='same', optional fused ReLU — im2col + Pallas matmul."""
    N, H, W, C = x.shape
    xb = x.astype(jnp.bfloat16)                # halve im2col HBM traffic
    xp = jnp.pad(xb, ((0, 0), (1, 1), (1, 1), (0, 0)))
    taps = [xp[:, ky:ky + H, kx:kx + W, :] for ky in range(3) for kx in range(3)]
    K = 9 * C                                   # (ky, kx, c) ordering
    Kp = layer["w"].shape[0] if layer["w"].dtype == jnp.bfloat16 else K
    if Kp > K:                                  # fold K padding into the concat
        taps.append(jnp.zeros((N, H, W, Kp - K), jnp.bfloat16))
    patches = jnp.concatenate(taps, axis=-1)    # (N, H, W, Kp)
    # TODO(synk): fuse the im2col into the Pallas kernel (tap axis in the
    # reduction with shifted-window A offsets) to avoid materializing the 9x
    # patch tensor at realistic spatial sizes.
    a = patches.reshape(N * H * W, Kp)
    out = matmul_bias_act(a, layer, relu)
    return out.reshape(N, H, W, -1)


def conv1x1(x, layer):
    N, H, W, C = x.shape
    a = x.reshape(N * H * W, C)
    out = matmul_bias_act(a, layer, relu=False)
    return out.reshape(N, H, W, -1)


def maxpool2(x):
    N, H, W, C = x.shape
    return x.reshape(N, H // 2, 2, W // 2, 2, C).max(axis=(2, 4))


def upsample2_nearest(x):
    N, H, W, C = x.shape
    x = jnp.broadcast_to(x[:, :, None, :, None, :], (N, H, 2, W, 2, C))
    return x.reshape(N, 2 * H, 2 * W, C)


def conv_pass(x, pair):
    """funlib ConvPass: two 3x3 'same' convs, each followed by ReLU."""
    x = conv3x3_same(x, pair[0], relu=True)
    x = conv3x3_same(x, pair[1], relu=True)
    return x


# ---------------------------------------------------------------------------
# UNet2d(in_ch, num_fmaps=12, fmap_inc=5, downsample=[[2,2]]*3,
#        padding='same', constant_upsample=True)
# ---------------------------------------------------------------------------
def unet_forward(x, params, n_down=3):
    skips = []
    f = x
    for level in range(n_down + 1):
        f = conv_pass(f, params["l"][level])
        if level < n_down:
            skips.append(f)
            f = maxpool2(f)
    for level in range(n_down - 1, -1, -1):
        up = upsample2_nearest(f)                         # constant (nearest) upsample
        f = jnp.concatenate([skips[level], up], axis=-1)  # [f_left, g_up] like funlib
        f = conv_pass(f, params["r"][level])
    return f


# ---------------------------------------------------------------------------
# Deterministic parameter construction (synthetic, He-style init)
# ---------------------------------------------------------------------------
def _conv_params(key, cin, cout, ksize):
    k1, k2 = jax.random.split(key)
    fan_in = cin * ksize * ksize
    std = (2.0 / fan_in) ** 0.5
    w = jax.random.normal(k1, (ksize, ksize, cin, cout), jnp.float32) * std
    b = jax.random.normal(k2, (cout,), jnp.float32) * 0.01
    return {"w": w, "b": b}


def init_unet(key, in_channels, num_fmaps=12, inc=5, n_down=3):
    ch = [num_fmaps * inc ** l for l in range(n_down + 1)]  # [12, 60, 300, 1500]
    keys = iter(jax.random.split(key, 64))
    l_conv, r_conv = [], []
    for level in range(n_down + 1):
        cin = in_channels if level == 0 else ch[level - 1]
        l_conv.append([_conv_params(next(keys), cin, ch[level], 3),
                       _conv_params(next(keys), ch[level], ch[level], 3)])
    for level in range(n_down):
        cin = ch[level] + ch[level + 1]
        r_conv.append([_conv_params(next(keys), cin, ch[level], 3),
                       _conv_params(next(keys), ch[level], ch[level], 3)])
    return {"l": l_conv, "r": r_conv}


def init_acrlsd(key):
    k1, k2, k3, k4 = jax.random.split(key, 4)
    return {
        "model_lsds": init_unet(k1, in_channels=1),
        "lsd_predict": _conv_params(k2, 12, 6, 1),
        "model_affinity": init_unet(k3, in_channels=7),
        "affinity_predict": _conv_params(k4, 12, 2, 1),
    }


# ---------------------------------------------------------------------------
# One-off weight preparation (hoisted out of the per-forward hot path):
# reshape to matmul layout, cast to bf16 and pad K/N to the kernel tiles.
# Tiny layers stay f32/unpadded and bypass Pallas.
# ---------------------------------------------------------------------------
def _prepare_conv(p, ksize):
    w, b = p["w"], p["b"]
    cin, cout = w.shape[2], w.shape[3]
    K, N = ksize * ksize * cin, cout
    wm = w.reshape(K, N)
    b = b.astype(jnp.float32)
    if N < 32 or K < 64:                         # tiny layer: XLA bypass path
        return {"w": wm.astype(jnp.float32), "b": b}
    Kp, Np = _kn_padding(K, N)
    wp = jnp.pad(wm.astype(jnp.bfloat16), ((0, Kp - K), (0, Np - N)))
    return {"w": wp, "b": b}


def prepare_params(params):
    def prep_unet(u):
        return {"l": [[_prepare_conv(c, 3) for c in pair] for pair in u["l"]],
                "r": [[_prepare_conv(c, 3) for c in pair] for pair in u["r"]]}
    return {
        "model_lsds": prep_unet(params["model_lsds"]),
        "lsd_predict": _prepare_conv(params["lsd_predict"], 1),
        "model_affinity": prep_unet(params["model_affinity"]),
        "affinity_predict": _prepare_conv(params["affinity_predict"], 1),
    }


# ---------------------------------------------------------------------------
# ACRLSD forward (NCHW in / NCHW out, matching the PyTorch module)
# ---------------------------------------------------------------------------
def acrlsd_forward(prepared, x_nchw):
    assert x_nchw.shape[2] % 8 == 0 and x_nchw.shape[3] % 8 == 0, \
        "H and W must be divisible by 2**3 for the three 2x2 downsamples"
    x = jnp.transpose(x_nchw, (0, 2, 3, 1))                      # NCHW -> NHWC

    y_lsds = conv1x1(unet_forward(x, prepared["model_lsds"]),
                     prepared["lsd_predict"])

    y_concat = jnp.concatenate([x, jax.lax.stop_gradient(y_lsds)], axis=-1)

    y_aff = conv1x1(unet_forward(y_concat, prepared["model_affinity"]),
                    prepared["affinity_predict"])

    return (jnp.transpose(y_lsds, (0, 3, 1, 2)),                 # (N, 6, H, W)
            jnp.transpose(y_aff, (0, 3, 1, 2)))                  # (N, 2, H, W)


# ---------------------------------------------------------------------------
if __name__ == "__main__":
    key = jax.random.PRNGKey(0)
    kx, kp = jax.random.split(key)

    # Small input consistent with the module: batch=2, 1 channel, 16x16
    # (spatial divisible by 2**3 for the three 2x2 downsamples).
    x = jax.random.normal(kx, (2, 1, 16, 16), jnp.float32)       # NCHW
    params = init_acrlsd(kp)
    prepared = prepare_params(params)        # one-off bf16 cast + K/N padding

    fwd = jax.jit(acrlsd_forward)
    y_lsds, y_affinity = fwd(prepared, x)
    jax.block_until_ready((y_lsds, y_affinity))

    assert y_lsds.shape == (2, 6, 16, 16), y_lsds.shape
    assert y_affinity.shape == (2, 2, 16, 16), y_affinity.shape
    assert jnp.all(jnp.isfinite(y_lsds)) and jnp.all(jnp.isfinite(y_affinity))

    print("KERNEL_OK")
</pallas_src>

<mosaic_0001>
module attributes {stable_mosaic.version = 11 : i64} {
  func.func @_mm_kernel(%arg0: i32, %arg1: i32, %arg2: i32, %arg3: memref<128x128xbf16, #tpu.memory_space<vmem>>, %arg4: memref<128x128xbf16, #tpu.memory_space<vmem>>, %arg5: memref<1x128xf32, #tpu.memory_space<vmem>>, %arg6: memref<128x128xf32, #tpu.memory_space<vmem>>) attributes {dimension_semantics = [#tpu.dimension_semantics<parallel>, #tpu.dimension_semantics<parallel>, #tpu.dimension_semantics<arbitrary>], iteration_bounds = array<i64: 1, 1, 1>, scalar_prefetch = 0 : i64, scratch_operands = 0 : i64, tpu.core_type = #tpu.core_type<tc>, window_params = [{transform_indices = @transform_0, window_bounds = array<i64: 128, 128>}, {transform_indices = @transform_1, window_bounds = array<i64: 128, 128>}, {transform_indices = @transform_2, window_bounds = array<i64: 1, 128>}, {transform_indices = @transform_3, window_bounds = array<i64: 128, 128>}]} {
    %c0_i32 = arith.constant 0 : i32
    %0 = arith.cmpi eq, %arg2, %c0_i32 : i32
    %1 = arith.extui %0 : i1 to i32
    %c0_i32_0 = arith.constant 0 : i32
    %2 = arith.cmpi ne, %1, %c0_i32_0 : i32
    scf.if %2 {
      %cst_10 = arith.constant 0.000000e+00 : f32
      %12 = vector.broadcast %cst_10 : f32 to vector<128x128xf32>
      %c0_11 = arith.constant 0 : index
      %c0_12 = arith.constant 0 : index
      %13 = vector.load %arg6[%c0_11, %c0_12] : memref<128x128xf32, #tpu.memory_space<vmem>>, vector<128x128xf32>
      tpu.vector_store %arg6[%c0_11, %c0_12], %12 {strides = array<i32>} : memref<128x128xf32, #tpu.memory_space<vmem>>, vector<128x128xf32>,
    } else {
    }
    %c0 = arith.constant 0 : index
    %c0_1 = arith.constant 0 : index
    %3 = vector.load %arg6[%c0, %c0_1] : memref<128x128xf32, #tpu.memory_space<vmem>>, vector<128x128xf32>
    %c0_2 = arith.constant 0 : index
    %c0_3 = arith.constant 0 : index
    %4 = vector.load %arg3[%c0_2, %c0_3] : memref<128x128xbf16, #tpu.memory_space<vmem>>, vector<128x128xbf16>
    %c0_4 = arith.constant 0 : index
    %c0_5 = arith.constant 0 : index
    %5 = vector.load %arg4[%c0_4, %c0_5] : memref<128x128xbf16, #tpu.memory_space<vmem>>, vector<128x128xbf16>
    %cst = arith.constant dense<0.000000e+00> : vector<128x128xf32>
    %6 = tpu.matmul %4, %5, %cst {dimension_numbers = #tpu.dot_dimension_numbers<[1], [0], [0], [1], [0, 0, 1, 1], [], []>} : vector<128x128xbf16>, vector<128x128xbf16>, vector<128x128xf32> -> vector<128x128xf32>
    %7 = arith.addf %3, %6 : vector<128x128xf32>
    %c0_6 = arith.constant 0 : index
    %c0_7 = arith.constant 0 : index
    %8 = vector.load %arg6[%c0_6, %c0_7] : memref<128x128xf32, #tpu.memory_space<vmem>>, vector<128x128xf32>
    tpu.vector_store %arg6[%c0_6, %c0_7], %7 {strides = array<i32>} : memref<128x128xf32, #tpu.memory_space<vmem>>, vector<128x128xf32>,
    %c0_i32_8 = arith.constant 0 : i32
    %9 = arith.cmpi eq, %arg2, %c0_i32_8 : i32
    %10 = arith.extui %9 : i1 to i32
    %c0_i32_9 = arith.constant 0 : i32
    %11 = arith.cmpi ne, %10, %c0_i32_9 : i32
    scf.if %11 {
      %c0_10 = arith.constant 0 : index
      %c0_11 = arith.constant 0 : index
      %12 = vector.load %arg6[%c0_10, %c0_11] : memref<128x128xf32, #tpu.memory_space<vmem>>, vector<128x128xf32>
      %c0_12 = arith.constant 0 : index
      %c0_13 = arith.constant 0 : index
      %13 = vector.load %arg5[%c0_12, %c0_13] : memref<1x128xf32, #tpu.memory_space<vmem>>, vector<1x128xf32>
      %14 = vector.broadcast %13 : vector<1x128xf32> to vector<128x128xf32>
      %15 = arith.addf %12, %14 : vector<128x128xf32>
      %cst_14 = arith.constant 0.000000e+00 : f32
      %16 = vector.broadcast %cst_14 : f32 to vector<128x128xf32>
      %17 = arith.maximumf %15, %16 : vector<128x128xf32>
      %c0_15 = arith.constant 0 : index
      %c0_16 = arith.constant 0 : index
      %18 = vector.load %arg6[%c0_15, %c0_16] : memref<128x128xf32, #tpu.memory_space<vmem>>, vector<128x128xf32>
      tpu.vector_store %arg6[%c0_15, %c0_16], %17 {strides = array<i32>} : memref<128x128xf32, #tpu.memory_space<vmem>>, vector<128x128xf32>,
    } else {
    }
    return
  }
  func.func @transform_0(%arg0: i32, %arg1: i32, %arg2: i32) -> (i32, i32) {
    %c0_i32 = arith.constant 0 : i32
    return %arg0, %arg2 : i32, i32
  }
  func.func @transform_1(%arg0: i32, %arg1: i32, %arg2: i32) -> (i32, i32) {
    %c0_i32 = arith.constant 0 : i32
    return %arg2, %arg1 : i32, i32
  }
  func.func @transform_2(%arg0: i32, %arg1: i32, %arg2: i32) -> (i32, i32) {
    %c0_i32 = arith.constant 0 : i32
    %c0_i32_0 = arith.constant 0 : i32
    return %c0_i32, %arg1 : i32, i32
  }
  func.func @transform_3(%arg0: i32, %arg1: i32, %arg2: i32) -> (i32, i32) {
    %c0_i32 = arith.constant 0 : i32
    return %arg0, %arg1 : i32, i32
  }
}

module attributes {stable_mosaic.version = 11 : i64} {
  func.func @_mm_kernel(%arg0: i32, %arg1: i32, %arg2: i32, %arg3: memref<128x640xbf16, #tpu.memory_space<vmem>>, %arg4: memref<640x128xbf16, #tpu.memory_space<vmem>>, %arg5: memref<1x128xf32, #tpu.memory_space<vmem>>, %arg6: memref<128x128xf32, #tpu.memory_space<vmem>>) attributes {dimension_semantics = [#tpu.dimension_semantics<parallel>, #tpu.dimension_semantics<parallel>, #tpu.dimension_semantics<arbitrary>], iteration_bounds = array<i64: 1, 1, 1>, scalar_prefetch = 0 : i64, scratch_operands = 0 : i64, tpu.core_type = #tpu.core_type<tc>, window_params = [{transform_indices = @transform_0, window_bounds = array<i64: 128, 640>}, {transform_indices = @transform_1, window_bounds = array<i64: 640, 128>}, {transform_indices = @transform_2, window_bounds = array<i64: 1, 128>}, {transform_indices = @transform_3, window_bounds = array<i64: 128, 128>}]} {
    %c0_i32 = arith.constant 0 : i32
    %0 = arith.cmpi eq, %arg2, %c0_i32 : i32
    %1 = arith.extui %0 : i1 to i32
    %c0_i32_0 = arith.constant 0 : i32
    %2 = arith.cmpi ne, %1, %c0_i32_0 : i32
    scf.if %2 {
      %cst_10 = arith.constant 0.000000e+00 : f32
      %12 = vector.broadcast %cst_10 : f32 to vector<128x128xf32>
      %c0_11 = arith.constant 0 : index
      %c0_12 = arith.constant 0 : index
      %13 = vector.load %arg6[%c0_11, %c0_12] : memref<128x128xf32, #tpu.memory_space<vmem>>, vector<128x128xf32>
      tpu.vector_store %arg6[%c0_11, %c0_12], %12 {strides = array<i32>} : memref<128x128xf32, #tpu.memory_space<vmem>>, vector<128x128xf32>,
    } else {
    }
    %c0 = arith.constant 0 : index
    %c0_1 = arith.constant 0 : index
    %3 = vector.load %arg6[%c0, %c0_1] : memref<128x128xf32, #tpu.memory_space<vmem>>, vector<128x128xf32>
    %c0_2 = arith.constant 0 : index
    %c0_3 = arith.constant 0 : index
    %4 = vector.load %arg3[%c0_2, %c0_3] : memref<128x640xbf16, #tpu.memory_space<vmem>>, vector<128x640xbf16>
    %c0_4 = arith.constant 0 : index
    %c0_5 = arith.constant 0 : index
    %5 = vector.load %arg4[%c0_4, %c0_5] : memref<640x128xbf16, #tpu.memory_space<vmem>>, vector<640x128xbf16>
    %cst = arith.constant dense<0.000000e+00> : vector<128x128xf32>
    %6 = tpu.matmul %4, %5, %cst {dimension_numbers = #tpu.dot_dimension_numbers<[1], [0], [0], [1], [0, 0, 1, 1], [], []>} : vector<128x640xbf16>, vector<640x128xbf16>, vector<128x128xf32> -> vector<128x128xf32>
    %7 = arith.addf %3, %6 : vector<128x128xf32>
    %c0_6 = arith.constant 0 : index
    %c0_7 = arith.constant 0 : index
    %8 = vector.load %arg6[%c0_6, %c0_7] : memref<128x128xf32, #tpu.memory_space<vmem>>, vector<128x128xf32>
    tpu.vector_store %arg6[%c0_6, %c0_7], %7 {strides = array<i32>} : memref<128x128xf32, #tpu.memory_space<vmem>>, vector<128x128xf32>,
    %c0_i32_8 = arith.constant 0 : i32
    %9 = arith.cmpi eq, %arg2, %c0_i32_8 : i32
    %10 = arith.extui %9 : i1 to i32
    %c0_i32_9 = arith.constant 0 : i32
    %11 = arith.cmpi ne, %10, %c0_i32_9 : i32
    scf.if %11 {
      %c0_10 = arith.constant 0 : index
      %c0_11 = arith.constant 0 : index
      %12 = vector.load %arg6[%c0_10, %c0_11] : memref<128x128xf32, #tpu.memory_space<vmem>>, vector<128x128xf32>
      %c0_12 = arith.constant 0 : index
      %c0_13 = arith.constant 0 : index
      %13 = vector.load %arg5[%c0_12, %c0_13] : memref<1x128xf32, #tpu.memory_space<vmem>>, vector<1x128xf32>
      %14 = vector.broadcast %13 : vector<1x128xf32> to vector<128x128xf32>
      %15 = arith.addf %12, %14 : vector<128x128xf32>
      %cst_14 = arith.constant 0.000000e+00 : f32
      %16 = vector.broadcast %cst_14 : f32 to vector<128x128xf32>
      %17 = arith.maximumf %15, %16 : vector<128x128xf32>
      %c0_15 = arith.constant 0 : index
      %c0_16 = arith.constant 0 : index
      %18 = vector.load %arg6[%c0_15, %c0_16] : memref<128x128xf32, #tpu.memory_space<vmem>>, vector<128x128xf32>
      tpu.vector_store %arg6[%c0_15, %c0_16], %17 {strides = array<i32>} : memref<128x128xf32, #tpu.memory_space<vmem>>, vector<128x128xf32>,
    } else {
    }
    return
  }
  func.func @transform_0(%arg0: i32, %arg1: i32, %arg2: i32) -> (i32, i32) {
    %c0_i32 = arith.constant 0 : i32
    return %arg0, %arg2 : i32, i32
  }
  func.func @transform_1(%arg0: i32, %arg1: i32, %arg2: i32) -> (i32, i32) {
    %c0_i32 = arith.constant 0 : i32
    return %arg2, %arg1 : i32, i32
  }
  func.func @transform_2(%arg0: i32, %arg1: i32, %arg2: i32) -> (i32, i32) {
    %c0_i32 = arith.constant 0 : i32
    %c0_i32_0 = arith.constant 0 : i32
    return %c0_i32, %arg1 : i32, i32
  }
  func.func @transform_3(%arg0: i32, %arg1: i32, %arg2: i32) -> (i32, i32) {
    %c0_i32 = arith.constant 0 : i32
    return %arg0, %arg1 : i32, i32
  }
}

module attributes {stable_mosaic.version = 11 : i64} {
  func.func @_mm_kernel(%arg0: i32, %arg1: i32, %arg2: i32, %arg3: memref<128x512xbf16, #tpu.memory_space<vmem>>, %arg4: memref<512x128xbf16, #tpu.memory_space<vmem>>, %arg5: memref<1x128xf32, #tpu.memory_space<vmem>>, %arg6: memref<128x128xf32, #tpu.memory_space<vmem>>) attributes {dimension_semantics = [#tpu.dimension_semantics<parallel>, #tpu.dimension_semantics<parallel>, #tpu.dimension_semantics<arbitrary>], iteration_bounds = array<i64: 1, 1, 7>, scalar_prefetch = 0 : i64, scratch_operands = 0 : i64, tpu.core_type = #tpu.core_type<tc>, window_params = [{transform_indices = @transform_0, window_bounds = array<i64: 128, 512>}, {transform_indices = @transform_1, window_bounds = array<i64: 512, 128>}, {transform_indices = @transform_2, window_bounds = array<i64: 1, 128>}, {transform_indices = @transform_3, window_bounds = array<i64: 128, 128>}]} {
    %c0_i32 = arith.constant 0 : i32
    %0 = arith.cmpi eq, %arg2, %c0_i32 : i32
    %1 = arith.extui %0 : i1 to i32
    %c0_i32_0 = arith.constant 0 : i32
    %2 = arith.cmpi ne, %1, %c0_i32_0 : i32
    scf.if %2 {
      %cst_9 = arith.constant 0.000000e+00 : f32
      %12 = vector.broadcast %cst_9 : f32 to vector<128x128xf32>
      %c0_10 = arith.constant 0 : index
      %c0_11 = arith.constant 0 : index
      %13 = vector.load %arg6[%c0_10, %c0_11] : memref<128x128xf32, #tpu.memory_space<vmem>>, vector<128x128xf32>
      tpu.vector_store %arg6[%c0_10, %c0_11], %12 {strides = array<i32>} : memref<128x128xf32, #tpu.memory_space<vmem>>, vector<128x128xf32>,
    } else {
    }
    %c0 = arith.constant 0 : index
    %c0_1 = arith.constant 0 : index
    %3 = vector.load %arg6[%c0, %c0_1] : memref<128x128xf32, #tpu.memory_space<vmem>>, vector<128x128xf32>
    %c0_2 = arith.constant 0 : index
    %c0_3 = arith.constant 0 : index
    %4 = vector.load %arg3[%c0_2, %c0_3] : memref<128x512xbf16, #tpu.memory_space<vmem>>, vector<128x512xbf16>
    %c0_4 = arith.constant 0 : index
    %c0_5 = arith.constant 0 : index
    %5 = vector.load %arg4[%c0_4, %c0_5] : memref<512x128xbf16, #tpu.memory_space<vmem>>, vector<512x128xbf16>
    %cst = arith.constant dense<0.000000e+00> : vector<128x128xf32>
    %6 = tpu.matmul %4, %5, %cst {dimension_numbers = #tpu.dot_dimension_numbers<[1], [0], [0], [1], [0, 0, 1, 1], [], []>} : vector<128x512xbf16>, vector<512x128xbf16>, vector<128x128xf32> -> vector<128x128xf32>
    %7 = arith.addf %3, %6 : vector<128x128xf32>
    %c0_6 = arith.constant 0 : index
    %c0_7 = arith.constant 0 : index
    %8 = vector.load %arg6[%c0_6, %c0_7] : memref<128x128xf32, #tpu.memory_space<vmem>>, vector<128x128xf32>
    tpu.vector_store %arg6[%c0_6, %c0_7], %7 {strides = array<i32>} : memref<128x128xf32, #tpu.memory_space<vmem>>, vector<128x128xf32>,
    %c6_i32 = arith.constant 6 : i32
    %9 = arith.cmpi eq, %arg2, %c6_i32 : i32
    %10 = arith.extui %9 : i1 to i32
    %c0_i32_8 = arith.constant 0 : i32
    %11 = arith.cmpi ne, %10, %c0_i32_8 : i32
    scf.if %11 {
      %c0_9 = arith.constant 0 : index
      %c0_10 = arith.constant 0 : index
      %12 = vector.load %arg6[%c0_9, %c0_10] : memref<128x128xf32, #tpu.memory_space<vmem>>, vector<128x128xf32>
      %c0_11 = arith.constant 0 : index
      %c0_12 = arith.constant 0 : index
      %13 = vector.load %arg5[%c0_11, %c0_12] : memref<1x128xf32, #tpu.memory_space<vmem>>, vector<1x128xf32>
      %14 = vector.broadcast %13 : vector<1x128xf32> to vector<128x128xf32>
      %15 = arith.addf %12, %14 : vector<128x128xf32>
      %cst_13 = arith.constant 0.000000e+00 : f32
      %16 = vector.broadcast %cst_13 : f32 to vector<128x128xf32>
      %17 = arith.maximumf %15, %16 : vector<128x128xf32>
      %c0_14 = arith.constant 0 : index
      %c0_15 = arith.constant 0 : index
      %18 = vector.load %arg6[%c0_14, %c0_15] : memref<128x128xf32, #tpu.memory_space<vmem>>, vector<128x128xf32>
      tpu.vector_store %arg6[%c0_14, %c0_15], %17 {strides = array<i32>} : memref<128x128xf32, #tpu.memory_space<vmem>>, vector<128x128xf32>,
    } else {
    }
    return
  }
  func.func @transform_0(%arg0: i32, %arg1: i32, %arg2: i32) -> (i32, i32) {
    %c0_i32 = arith.constant 0 : i32
    return %arg0, %arg2 : i32, i32
  }
  func.func @transform_1(%arg0: i32, %arg1: i32, %arg2: i32) -> (i32, i32) {
    %c0_i32 = arith.constant 0 : i32
    return %arg2, %arg1 : i32, i32
  }
  func.func @transform_2(%arg0: i32, %arg1: i32, %arg2: i32) -> (i32, i32) {
    %c0_i32 = arith.constant 0 : i32
    %c0_i32_0 = arith.constant 0 : i32
    return %c0_i32, %arg1 : i32, i32
  }
  func.func @transform_3(%arg0: i32, %arg1: i32, %arg2: i32) -> (i32, i32) {
    %c0_i32 = arith.constant 0 : i32
    return %arg0, %arg1 : i32, i32
  }
}

module attributes {stable_mosaic.version = 11 : i64} {
  func.func @_mm_kernel(%arg0: i32, %arg1: i32, %arg2: i32, %arg3: memref<128x640xbf16, #tpu.memory_space<vmem>>, %arg4: memref<640x128xbf16, #tpu.memory_space<vmem>>, %arg5: memref<1x128xf32, #tpu.memory_space<vmem>>, %arg6: memref<128x128xf32, #tpu.memory_space<vmem>>) attributes {dimension_semantics = [#tpu.dimension_semantics<parallel>, #tpu.dimension_semantics<parallel>, #tpu.dimension_semantics<arbitrary>], iteration_bounds = array<i64: 1, 1, 1>, scalar_prefetch = 0 : i64, scratch_operands = 0 : i64, tpu.core_type = #tpu.core_type<tc>, window_params = [{transform_indices = @transform_0, window_bounds = array<i64: 128, 640>}, {transform_indices = @transform_1, window_bounds = array<i64: 640, 128>}, {transform_indices = @transform_2, window_bounds = array<i64: 1, 128>}, {transform_indices = @transform_3, window_bounds = array<i64: 128, 128>}]} {
    %c0_i32 = arith.constant 0 : i32
    %0 = arith.cmpi eq, %arg2, %c0_i32 : i32
    %1 = arith.extui %0 : i1 to i32
    %c0_i32_0 = arith.constant 0 : i32
    %2 = arith.cmpi ne, %1, %c0_i32_0 : i32
    scf.if %2 {
      %cst_10 = arith.constant 0.000000e+00 : f32
      %12 = vector.broadcast %cst_10 : f32 to vector<128x128xf32>
      %c0_11 = arith.constant 0 : index
      %c0_12 = arith.constant 0 : index
      %13 = vector.load %arg6[%c0_11, %c0_12] : memref<128x128xf32, #tpu.memory_space<vmem>>, vector<128x128xf32>
      tpu.vector_store %arg6[%c0_11, %c0_12], %12 {strides = array<i32>} : memref<128x128xf32, #tpu.memory_space<vmem>>, vector<128x128xf32>,
    } else {
    }
    %c0 = arith.constant 0 : index
    %c0_1 = arith.constant 0 : index
    %3 = vector.load %arg6[%c0, %c0_1] : memref<128x128xf32, #tpu.memory_space<vmem>>, vector<128x128xf32>
    %c0_2 = arith.constant 0 : index
    %c0_3 = arith.constant 0 : index
    %4 = vector.load %arg3[%c0_2, %c0_3] : memref<128x640xbf16, #tpu.memory_space<vmem>>, vector<128x640xbf16>
    %c0_4 = arith.constant 0 : index
    %c0_5 = arith.constant 0 : index
    %5 = vector.load %arg4[%c0_4, %c0_5] : memref<640x128xbf16, #tpu.memory_space<vmem>>, vector<640x128xbf16>
    %cst = arith.constant dense<0.000000e+00> : vector<128x128xf32>
    %6 = tpu.matmul %4, %5, %cst {dimension_numbers = #tpu.dot_dimension_numbers<[1], [0], [0], [1], [0, 0, 1, 1], [], []>} : vector<128x640xbf16>, vector<640x128xbf16>, vector<128x128xf32> -> vector<128x128xf32>
    %7 = arith.addf %3, %6 : vector<128x128xf32>
    %c0_6 = arith.constant 0 : index
    %c0_7 = arith.constant 0 : index
    %8 = vector.load %arg6[%c0_6, %c0_7] : memref<128x128xf32, #tpu.memory_space<vmem>>, vector<128x128xf32>
    tpu.vector_store %arg6[%c0_6, %c0_7], %7 {strides = array<i32>} : memref<128x128xf32, #tpu.memory_space<vmem>>, vector<128x128xf32>,
    %c0_i32_8 = arith.constant 0 : i32
    %9 = arith.cmpi eq, %arg2, %c0_i32_8 : i32
    %10 = arith.extui %9 : i1 to i32
    %c0_i32_9 = arith.constant 0 : i32
    %11 = arith.cmpi ne, %10, %c0_i32_9 : i32
    scf.if %11 {
      %c0_10 = arith.constant 0 : index
      %c0_11 = arith.constant 0 : index
      %12 = vector.load %arg6[%c0_10, %c0_11] : memref<128x128xf32, #tpu.memory_space<vmem>>, vector<128x128xf32>
      %c0_12 = arith.constant 0 : index
      %c0_13 = arith.constant 0 : index
      %13 = vector.load %arg5[%c0_12, %c0_13] : memref<1x128xf32, #tpu.memory_space<vmem>>, vector<1x128xf32>
      %14 = vector.broadcast %13 : vector<1x128xf32> to vector<128x128xf32>
      %15 = arith.addf %12, %14 : vector<128x128xf32>
      %cst_14 = arith.constant 0.000000e+00 : f32
      %16 = vector.broadcast %cst_14 : f32 to vector<128x128xf32>
      %17 = arith.maximumf %15, %16 : vector<128x128xf32>
      %c0_15 = arith.constant 0 : index
      %c0_16 = arith.constant 0 : index
      %18 = vector.load %arg6[%c0_15, %c0_16] : memref<128x128xf32, #tpu.memory_space<vmem>>, vector<128x128xf32>
      tpu.vector_store %arg6[%c0_15, %c0_16], %17 {strides = array<i32>} : memref<128x128xf32, #tpu.memory_space<vmem>>, vector<128x128xf32>,
    } else {
    }
    return
  }
  func.func @transform_0(%arg0: i32, %arg1: i32, %arg2: i32) -> (i32, i32) {
    %c0_i32 = arith.constant 0 : i32
    return %arg0, %arg2 : i32, i32
  }
  func.func @transform_1(%arg0: i32, %arg1: i32, %arg2: i32) -> (i32, i32) {
    %c0_i32 = arith.constant 0 : i32
    return %arg2, %arg1 : i32, i32
  }
  func.func @transform_2(%arg0: i32, %arg1: i32, %arg2: i32) -> (i32, i32) {
    %c0_i32 = arith.constant 0 : i32
    %c0_i32_0 = arith.constant 0 : i32
    return %c0_i32, %arg1 : i32, i32
  }
  func.func @transform_3(%arg0: i32, %arg1: i32, %arg2: i32) -> (i32, i32) {
    %c0_i32 = arith.constant 0 : i32
    return %arg0, %arg1 : i32, i32
  }
}

module attributes {stable_mosaic.version = 11 : i64} {
  func.func @_mm_kernel(%arg0: i32, %arg1: i32, %arg2: i32, %arg3: memref<128x128xbf16, #tpu.memory_space<vmem>>, %arg4: memref<128x128xbf16, #tpu.memory_space<vmem>>, %arg5: memref<1x128xf32, #tpu.memory_space<vmem>>, %arg6: memref<128x128xf32, #tpu.memory_space<vmem>>) attributes {dimension_semantics = [#tpu.dimension_semantics<parallel>, #tpu.dimension_semantics<parallel>, #tpu.dimension_semantics<arbitrary>], iteration_bounds = array<i64: 1, 1, 1>, scalar_prefetch = 0 : i64, scratch_operands = 0 : i64, tpu.core_type = #tpu.core_type<tc>, window_params = [{transform_indices = @transform_0, window_bounds = array<i64: 128, 128>}, {transform_indices = @transform_1, window_bounds = array<i64: 128, 128>}, {transform_indices = @transform_2, window_bounds = array<i64: 1, 128>}, {transform_indices = @transform_3, window_bounds = array<i64: 128, 128>}]} {
    %c0_i32 = arith.constant 0 : i32
    %0 = arith.cmpi eq, %arg2, %c0_i32 : i32
    %1 = arith.extui %0 : i1 to i32
    %c0_i32_0 = arith.constant 0 : i32
    %2 = arith.cmpi ne, %1, %c0_i32_0 : i32
    scf.if %2 {
      %cst_10 = arith.constant 0.000000e+00 : f32
      %12 = vector.broadcast %cst_10 : f32 to vector<128x128xf32>
      %c0_11 = arith.constant 0 : index
      %c0_12 = arith.constant 0 : index
      %13 = vector.load %arg6[%c0_11, %c0_12] : memref<128x128xf32, #tpu.memory_space<vmem>>, vector<128x128xf32>
      tpu.vector_store %arg6[%c0_11, %c0_12], %12 {strides = array<i32>} : memref<128x128xf32, #tpu.memory_space<vmem>>, vector<128x128xf32>,
    } else {
    }
    %c0 = arith.constant 0 : index
    %c0_1 = arith.constant 0 : index
    %3 = vector.load %arg6[%c0, %c0_1] : memref<128x128xf32, #tpu.memory_space<vmem>>, vector<128x128xf32>
    %c0_2 = arith.constant 0 : index
    %c0_3 = arith.constant 0 : index
    %4 = vector.load %arg3[%c0_2, %c0_3] : memref<128x128xbf16, #tpu.memory_space<vmem>>, vector<128x128xbf16>
    %c0_4 = arith.constant 0 : index
    %c0_5 = arith.constant 0 : index
    %5 = vector.load %arg4[%c0_4, %c0_5] : memref<128x128xbf16, #tpu.memory_space<vmem>>, vector<128x128xbf16>
    %cst = arith.constant dense<0.000000e+00> : vector<128x128xf32>
    %6 = tpu.matmul %4, %5, %cst {dimension_numbers = #tpu.dot_dimension_numbers<[1], [0], [0], [1], [0, 0, 1, 1], [], []>} : vector<128x128xbf16>, vector<128x128xbf16>, vector<128x128xf32> -> vector<128x128xf32>
    %7 = arith.addf %3, %6 : vector<128x128xf32>
    %c0_6 = arith.constant 0 : index
    %c0_7 = arith.constant 0 : index
    %8 = vector.load %arg6[%c0_6, %c0_7] : memref<128x128xf32, #tpu.memory_space<vmem>>, vector<128x128xf32>
    tpu.vector_store %arg6[%c0_6, %c0_7], %7 {strides = array<i32>} : memref<128x128xf32, #tpu.memory_space<vmem>>, vector<128x128xf32>,
    %c0_i32_8 = arith.constant 0 : i32
    %9 = arith.cmpi eq, %arg2, %c0_i32_8 : i32
    %10 = arith.extui %9 : i1 to i32
    %c0_i32_9 = arith.constant 0 : i32
    %11 = arith.cmpi ne, %10, %c0_i32_9 : i32
    scf.if %11 {
      %c0_10 = arith.constant 0 : index
      %c0_11 = arith.constant 0 : index
      %12 = vector.load %arg6[%c0_10, %c0_11] : memref<128x128xf32, #tpu.memory_space<vmem>>, vector<128x128xf32>
      %c0_12 = arith.constant 0 : index
      %c0_13 = arith.constant 0 : index
      %13 = vector.load %arg5[%c0_12, %c0_13] : memref<1x128xf32, #tpu.memory_space<vmem>>, vector<1x128xf32>
      %14 = vector.broadcast %13 : vector<1x128xf32> to vector<128x128xf32>
      %15 = arith.addf %12, %14 : vector<128x128xf32>
      %cst_14 = arith.constant 0.000000e+00 : f32
      %16 = vector.broadcast %cst_14 : f32 to vector<128x128xf32>
      %17 = arith.maximumf %15, %16 : vector<128x128xf32>
      %c0_15 = arith.constant 0 : index
      %c0_16 = arith.constant 0 : index
      %18 = vector.load %arg6[%c0_15, %c0_16] : memref<128x128xf32, #tpu.memory_space<vmem>>, vector<128x128xf32>
      tpu.vector_store %arg6[%c0_15, %c0_16], %17 {strides = array<i32>} : memref<128x128xf32, #tpu.memory_space<vmem>>, vector<128x128xf32>,
    } else {
    }
    return
  }
  func.func @transform_0(%arg0: i32, %arg1: i32, %arg2: i32) -> (i32, i32) {
    %c0_i32 = arith.constant 0 : i32
    return %arg0, %arg2 : i32, i32
  }
  func.func @transform_1(%arg0: i32, %arg1: i32, %arg2: i32) -> (i32, i32) {
    %c0_i32 = arith.constant 0 : i32
    return %arg2, %arg1 : i32, i32
  }
  func.func @transform_2(%arg0: i32, %arg1: i32, %arg2: i32) -> (i32, i32) {
    %c0_i32 = arith.constant 0 : i32
    %c0_i32_0 = arith.constant 0 : i32
    return %c0_i32, %arg1 : i32, i32
  }
  func.func @transform_3(%arg0: i32, %arg1: i32, %arg2: i32) -> (i32, i32) {
    %c0_i32 = arith.constant 0 : i32
    return %arg0, %arg1 : i32, i32
  }
}

</mosaic_0001>

<bundles_post_ra>
// kernel: acrlsd_forward.8
= control target key start
LH: loop header
LB: loop body
LE: loop exit
PB: predicated region body
PF: predicated region fallthrough
CT: control target
= control target key end

     0   :  { %8 = vsyncpa [#allocation3], 0  ;;  %s526_s12 = smov [#allocation2]   ;;  %s636_s0 = inlined_call_operand.vmem [shape: bf16[128,128], index: 0, kind: input, shape index: {}]   ;;  %s637_s1 = inlined_call_operand.hbm [shape: bf16[128,128], index: 1, kind: input, shape index: {}]   ;;  %s638_s2 = inlined_call_operand.vmem [shape: f32[1,128], index: 2, kind: input, shape index: {}]   ;;  %s639_s3 = inlined_call_operand.vmem [shape: f32[128,128], index: 3, kind: output, shape index: {}]  }
   0x1   :  { %s16_s13 = sshll.u32 %s526_s12, 4  ;;  %s502_s16 = scalar_lea.hbm %s637_s1, 1024  ;;  %s17_s13 = int_to_ptr.vmem [resolvable:$true] %s16_s13 }
   0x2   :  { %p503_p0 = scmp.ne.s32.totalorder %s637_s1, %s502_s16  ;;  %p506_p1 = scmp.lt.u32.totalorder %s502_s16, %s637_s1 }
   0x4   :  { %p508_p2 = pnand %p506_p1, %p503_p0 }
   0x6   :  { %511 = shalt.err (!%p508_p2)
}
   0x7   :  { %s512_s21 = scalar_lea.vmem %s17_s13, 1024  ;;  %p517_p4 = scmp.lt.s32.totalorder %s17_s13, %s17_s13 }
   0x8   :  { %p513_p3 = scmp.ne.s32.totalorder %s17_s13, %s512_s21  ;;  %p518_p5 = scmp.lt.s32.totalorder %s512_s21, %s512_s21 }
   0xa   :  { %p519_p6 = por %p518_p5, %p517_p4 }
   0xc   :  { %p520_p7 = pnand %p519_p6, %p513_p3 }
   0xe   :  { %523 = shalt.err (!%p520_p7)
}
   0xf   :  { %s527_s22 = smov 64   ;;  %s528_s23 = smov 4  }
  0x10   :  { %22 = dma.hbm_to_vmem [thread:$0]  %s637_s1, 1024, %s17_s13, [#allocation3], %s527_s22, %s527_s22, %s528_s23  }
  0x11   :  { %524 = dma.done.wait [#allocation3], 1024  }
  0x12   :  { %525 = vsyncadd [#allocation3], 4294966272  ;;  %v486_v0 = vld [vmem:[#allocation2] sm:$0xff]   ;;  %v487_v1 = vld [vmem:[#allocation2 + $0x8] sm:$0xff]  }
  0x13   :  { %434 = vmatprep.subr.bf16.mxu0 %v486_v0  ;;  %466 = vmatprep.subr.bf16.mxu1 %v486_v0  ;;  %v488_v2 = vld [vmem:[#allocation2 + $0x10] sm:$0xff]   ;;  %v489_v3 = vld [vmem:[#allocation2 + $0x18] sm:$0xff]   ;;  %v494_v4 = vld [vmem:[%s636_s0] sm:$0xff]  }
  0x14   :  { %435 = vmatpush3.bf16.msra.mxu0 %v486_v0  ;;  %474 = vmatpush3.bf16.msra.mxu1 %v486_v0  ;;  %v495_v5 = vld [vmem:[%s636_s0 + $0x20] sm:$0xff]   ;;  %v491_v7 = vld [vmem:[#allocation2 + $0x28] sm:$0xff]   ;;  %v492_v8 = vld [vmem:[#allocation2 + $0x30] sm:$0xff]  }
  0x15   :  { %436 = vmatprep.subr.bf16.mxu0 %v487_v1  ;;  %467 = vmatprep.subr.bf16.mxu1 %v487_v1  ;;  %v490_v6 = vld [vmem:[#allocation2 + $0x20] sm:$0xff]   ;;  %v493_v9 = vld [vmem:[#allocation2 + $0x38] sm:$0xff]   ;;  %v496_v10 = vld [vmem:[%s636_s0 + $0x8] sm:$0xff]  }
  0x16   :  { %450 = vmatprep.mubr.bf16.mxu0 %v494_v4  ;;  %458 = vmatprep.mubr.bf16.mxu1 %v495_v5  ;;  %v497_v11 = vld [vmem:[%s636_s0 + $0x28] sm:$0xff]   ;;  %v498_v12 = vld [vmem:[%s636_s0 + $0x10] sm:$0xff]   ;;  %v500_v14 = vld [vmem:[%s636_s0 + $0x18] sm:$0xff]  }
  0x17   :  { %v499_v13 = vld [vmem:[%s636_s0 + $0x30] sm:$0xff]   ;;  %v501_v15 = vld [vmem:[%s636_s0 + $0x38] sm:$0xff]   ;;  %v417_v17 = vld [vmem:[%s638_s2] ss:$0 sm:$0xff] }
  0x18   :  { %437 = vmatpush3.bf16.msra.mxu0 %v487_v1  ;;  %475 = vmatpush3.bf16.msra.mxu1 %v487_v1 }
  0x19   :  { %438 = vmatprep.subr.bf16.mxu0 %v488_v2  ;;  %468 = vmatprep.subr.bf16.mxu1 %v488_v2 }
  0x1c   :  { %439 = vmatpush3.bf16.msra.mxu0 %v488_v2  ;;  %476 = vmatpush3.bf16.msra.mxu1 %v488_v2 }
  0x1d   :  { %440 = vmatprep.subr.bf16.mxu0 %v489_v3  ;;  %469 = vmatprep.subr.bf16.mxu1 %v489_v3 }
  0x20   :  { %441 = vmatpush3.bf16.msra.mxu0 %v489_v3  ;;  %477 = vmatpush3.bf16.msra.mxu1 %v489_v3 }
  0x21   :  { %442 = vmatprep.subr.bf16.mxu0 %v490_v6  ;;  %470 = vmatprep.subr.bf16.mxu1 %v490_v6 }
  0x24   :  { %443 = vmatpush3.bf16.msra.mxu0 %v490_v6  ;;  %478 = vmatpush3.bf16.msra.mxu1 %v490_v6 }
  0x25   :  { %444 = vmatprep.subr.bf16.mxu0 %v491_v7  ;;  %471 = vmatprep.subr.bf16.mxu1 %v491_v7 }
  0x28   :  { %445 = vmatpush3.bf16.msra.mxu0 %v491_v7  ;;  %479 = vmatpush3.bf16.msra.mxu1 %v491_v7 }
  0x29   :  { %446 = vmatprep.subr.bf16.mxu0 %v492_v8  ;;  %472 = vmatprep.subr.bf16.mxu1 %v492_v8 }
  0x2c   :  { %447 = vmatpush3.bf16.msra.mxu0 %v492_v8  ;;  %480 = vmatpush3.bf16.msra.mxu1 %v492_v8 }
  0x2d   :  { %448 = vmatprep.subr.bf16.mxu0 %v493_v9  ;;  %473 = vmatprep.subr.bf16.mxu1 %v493_v9 }
  0x30   :  { %449 = vmatpush3.bf16.msra.mxu0 %v493_v9  ;;  %481 = vmatpush3.bf16.msra.mxu1 %v493_v9 }
  0x33   :  { %451 = vmatmul.mubr.bf16.vlgmr.msra.gmra.mrb[0].mxu0 %v496_v10  ;;  %459 = vmatmul.mubr.bf16.vlgmr.msra.gmra.mrb[0].mxu1 %v497_v11 }
  0x34   :  { %454 = vmatprep.mubr.bf16.mxu0 %v498_v12  ;;  %462 = vmatprep.mubr.bf16.mxu1 %v499_v13 }
  0x3b   :  { %455 = vmatmul.mubr.bf16.gmra.mrb[4].mxu0 %v500_v14  ;;  %463 = vmatmul.mubr.bf16.gmra.mrb[4].mxu1 %v501_v15 }
 0x106   :  { %v452_v16 = vpop.f32.mrb[0].mxu0  ;;  %v460_v18 = vpop.f32.mrb[0].mxu1 }
 0x107   :  { %v227_v19 = vpop.f32.mrb[1].mxu0  ;;  %v259_v20 = vpop.f32.mrb[1].mxu1  ;;  %v350_v23 = vadd.f32 %v452_v16, %v417_v17  ;;  %v358_v24 = vadd.f32 %v460_v18, %v417_v17 }
 0x108   :  { %v453_v21 = vpop.f32.mrb[2].mxu0  ;;  %v461_v22 = vpop.f32.mrb[2].mxu1  ;;  %v348_v27 = vadd.f32 %v417_v17, %v227_v19  ;;  %v356_v28 = vadd.f32 %v417_v17, %v259_v20 }
 0x109   :  { %v230_v25 = vpop.f32.mrb[3].mxu0  ;;  %v262_v26 = vpop.f32.mrb[3].mxu1  ;;  %v366_v29 = vmax.f32 %v350_v23, 0.0  ;;  %v374_v30 = vmax.f32 %v358_v24, 0.0  ;;  %v351_v31 = vadd.f32 %v453_v21, %v417_v17  ;;  %v359_v32 = vadd.f32 %v461_v22, %v417_v17 }
 0x10a   :  { %v364_v33 = vmax.f32 %v348_v27, 0.0  ;;  %v372_v34 = vmax.f32 %v356_v28, 0.0  ;;  %v349_v35 = vadd.f32 %v417_v17, %v230_v25  ;;  %v357_v36 = vadd.f32 %v417_v17, %v262_v26 }
 0x10b   :  { %382 = vst [vmem:[%s639_s3 + $0x10] sm:$0xff] %v366_v29  ;;  %390 = vst [vmem:[%s639_s3 + $0x50] sm:$0xff] %v374_v30  ;;  %v367_v37 = vmax.f32 %v351_v31, 0.0  ;;  %v375_v38 = vmax.f32 %v359_v32, 0.0 }
 0x10c   :  { %380 = vst [vmem:[%s639_s3] sm:$0xff] %v364_v33  ;;  %388 = vst [vmem:[%s639_s3 + $0x40] sm:$0xff] %v372_v34  ;;  %v365_v39 = vmax.f32 %v349_v35, 0.0  ;;  %v373_v40 = vmax.f32 %v357_v36, 0.0 }
 0x10d   :  { %383 = vst [vmem:[%s639_s3 + $0x18] sm:$0xff] %v367_v37  ;;  %391 = vst [vmem:[%s639_s3 + $0x58] sm:$0xff] %v375_v38 }
 0x10e   :  { %v456_v41 = vpop.f32.mrb[4].mxu0  ;;  %v464_v42 = vpop.f32.mrb[4].mxu1  ;;  %381 = vst [vmem:[%s639_s3 + $0x8] sm:$0xff] %v365_v39  ;;  %389 = vst [vmem:[%s639_s3 + $0x48] sm:$0xff] %v373_v40 }
 0x10f   :  { %v243_v43 = vpop.f32.mrb[5].mxu0  ;;  %v275_v44 = vpop.f32.mrb[5].mxu1  ;;  %v354_v47 = vadd.f32 %v456_v41, %v417_v17  ;;  %v362_v48 = vadd.f32 %v464_v42, %v417_v17 }
 0x110   :  { %v457_v45 = vpop.f32.mrb[6].mxu0  ;;  %v465_v46 = vpop.f32.mrb[6].mxu1  ;;  %v352_v51 = vadd.f32 %v417_v17, %v243_v43  ;;  %v360_v52 = vadd.f32 %v417_v17, %v275_v44 }
 0x111   :  { %v246_v49 = vpop.f32.mrb[7].mxu0  ;;  %v278_v50 = vpop.f32.mrb[7].mxu1  ;;  %v370_v53 = vmax.f32 %v354_v47, 0.0  ;;  %v378_v54 = vmax.f32 %v362_v48, 0.0  ;;  %v355_v55 = vadd.f32 %v457_v45, %v417_v17  ;;  %v363_v56 = vadd.f32 %v465_v46, %v417_v17 }
 0x112   :  { %v368_v57 = vmax.f32 %v352_v51, 0.0  ;;  %v376_v58 = vmax.f32 %v360_v52, 0.0  ;;  %v353_v59 = vadd.f32 %v417_v17, %v246_v49  ;;  %v361_v60 = vadd.f32 %v417_v17, %v278_v50 }
 0x113   :  { %386 = vst [vmem:[%s639_s3 + $0x30] sm:$0xff] %v370_v53  ;;  %394 = vst [vmem:[%s639_s3 + $0x70] sm:$0xff] %v378_v54  ;;  %v371_v61 = vmax.f32 %v355_v55, 0.0  ;;  %v379_v62 = vmax.f32 %v363_v56, 0.0 }
 0x114   :  { %384 = vst [vmem:[%s639_s3 + $0x20] sm:$0xff] %v368_v57  ;;  %392 = vst [vmem:[%s639_s3 + $0x60] sm:$0xff] %v376_v58  ;;  %v369_v63 = vmax.f32 %v353_v59, 0.0  ;;  %v377_v0 = vmax.f32 %v361_v60, 0.0 }
 0x115   :  { %387 = vst [vmem:[%s639_s3 + $0x38] sm:$0xff] %v371_v61  ;;  %395 = vst [vmem:[%s639_s3 + $0x78] sm:$0xff] %v379_v62 }
 0x116   :  { %385 = vst [vmem:[%s639_s3 + $0x28] sm:$0xff] %v369_v63  ;;  %393 = vst [vmem:[%s639_s3 + $0x68] sm:$0xff] %v377_v0 }
 0x117   :  { %400 = vsyncpa [#allocation3], 1 }

// kernel: acrlsd_forward.9
= control target key start
LH: loop header
LB: loop body
LE: loop exit
PB: predicated region body
PF: predicated region fallthrough
CT: control target
= control target key end

     0   :  { %8 = vsyncpa [#allocation3], 0  ;;  %s1440_s12 = smov [#allocation2]   ;;  %s1691_s0 = inlined_call_operand.vmem [shape: bf16[128,640], index: 0, kind: input, shape index: {}]   ;;  %s1692_s1 = inlined_call_operand.hbm [shape: bf16[640,128], index: 1, kind: input, shape index: {}]   ;;  %s1693_s2 = inlined_call_operand.vmem [shape: f32[1,128], index: 2, kind: input, shape index: {}]   ;;  %s1694_s3 = inlined_call_operand.vmem [shape: f32[128,128], index: 3, kind: output, shape index: {}]  }
   0x1   :  { %s16_s13 = sshll.u32 %s1440_s12, 4  ;;  %s1416_s16 = scalar_lea.hbm %s1692_s1, 5120  ;;  %s17_s13 = int_to_ptr.vmem [resolvable:$true] %s16_s13 }
   0x2   :  { %p1417_p0 = scmp.ne.s32.totalorder %s1692_s1, %s1416_s16  ;;  %p1420_p1 = scmp.lt.u32.totalorder %s1416_s16, %s1692_s1 }
   0x4   :  { %p1422_p2 = pnand %p1420_p1, %p1417_p0 }
   0x6   :  { %1425 = shalt.err (!%p1422_p2)
}
   0x7   :  { %s1426_s21 = scalar_lea.vmem %s17_s13, 5120  ;;  %p1431_p4 = scmp.lt.s32.totalorder %s17_s13, %s17_s13 }
   0x8   :  { %p1427_p3 = scmp.ne.s32.totalorder %s17_s13, %s1426_s21  ;;  %p1432_p5 = scmp.lt.s32.totalorder %s1426_s21, %s1426_s21 }
   0xa   :  { %p1433_p6 = por %p1432_p5, %p1431_p4 }
   0xc   :  { %p1434_p7 = pnand %p1433_p6, %p1427_p3 }
   0xe   :  { %1437 = shalt.err (!%p1434_p7)
}
   0xf   :  { %s1441_s22 = smov 64   ;;  %s1442_s23 = smov 4  }
  0x10   :  { %22 = dma.hbm_to_vmem [thread:$0]  %s1692_s1, 5120, %s17_s13, [#allocation3], %s1441_s22, %s1441_s22, %s1442_s23  }
  0x11   :  { %1438 = dma.done.wait [#allocation3], 5120  }
  0x12   :  { %1439 = vsyncadd [#allocation3], 4294962176  ;;  %v1320_v0 = vld [vmem:[#allocation2 + $0x40] sm:$0xff]   ;;  %v1324_v4 = vld [vmem:[#allocation2 + $0x48] sm:$0xff]  }
  0x13   :  { %v1321_v1 = vld [vmem:[#allocation2 + $0xc0] sm:$0xff]   ;;  %1124 = vmatprep.subr.bf16.mxu0 %v1320_v0  ;;  %v1325_v5 = vld [vmem:[#allocation2 + $0xc8] sm:$0xff]   ;;  %v1328_v8 = vld [vmem:[#allocation2 + $0x50] sm:$0xff]  }
  0x14   :  { %v1322_v2 = vld [vmem:[#allocation2] sm:$0xff]   ;;  %1188 = vmatprep.subr.bf16.mxu1 %v1321_v1  ;;  %v1326_v6 = vld [vmem:[#allocation2 + $0x8] sm:$0xff]   ;;  %v1329_v9 = vld [vmem:[#allocation2 + $0xd0] sm:$0xff]  }
  0x15   :  { %v1323_v3 = vld [vmem:[#allocation2 + $0x80] sm:$0xff]   ;;  %1125 = vmatpush3.bf16.msra.mxu0 %v1322_v2  ;;  %v1327_v7 = vld [vmem:[#allocation2 + $0x88] sm:$0xff]   ;;  %v1330_v10 = vld [vmem:[#allocation2 + $0x10] sm:$0xff]  }
  0x16   :  { %1189 = vmatpush3.bf16.msra.mxu1 %v1323_v3  ;;  %1126 = vmatprep.subr.bf16.mxu0 %v1324_v4  ;;  %v1331_v11 = vld [vmem:[#allocation2 + $0x90] sm:$0xff]   ;;  %v1332_v12 = vld [vmem:[#allocation2 + $0x58] sm:$0xff]   ;;  %v1336_v16 = vld [vmem:[#allocation2 + $0x60] sm:$0xff]  }
  0x17   :  { %1190 = vmatprep.subr.bf16.mxu1 %v1325_v5  ;;  %v1333_v13 = vld [vmem:[#allocation2 + $0xd8] sm:$0xff]   ;;  %v1337_v17 = vld [vmem:[#allocation2 + $0xe0] sm:$0xff]   ;;  %v1340_v20 = vld [vmem:[#allocation2 + $0x68] sm:$0xff]  }
  0x18   :  { %v1334_v14 = vld [vmem:[#allocation2 + $0x18] sm:$0xff]   ;;  %v1338_v18 = vld [vmem:[#allocation2 + $0x20] sm:$0xff]   ;;  %v1341_v21 = vld [vmem:[#allocation2 + $0xe8] sm:$0xff]  }
  0x19   :  { %1127 = vmatpush3.bf16.msra.mxu0 %v1326_v6  ;;  %v1335_v15 = vld [vmem:[#allocation2 + $0x98] sm:$0xff]   ;;  %v1339_v19 = vld [vmem:[#allocation2 + $0xa0] sm:$0xff]   ;;  %v1342_v22 = vld [vmem:[#allocation2 + $0x28] sm:$0xff]  }
  0x1a   :  { %1191 = vmatpush3.bf16.msra.mxu1 %v1327_v7  ;;  %1128 = vmatprep.subr.bf16.mxu0 %v1328_v8  ;;  %v1343_v23 = vld [vmem:[#allocation2 + $0xa8] sm:$0xff]   ;;  %v1344_v24 = vld [vmem:[#allocation2 + $0x70] sm:$0xff]   ;;  %v1348_v28 = vld [vmem:[#allocation2 + $0x78] sm:$0xff]  }
  0x1b   :  { %1192 = vmatprep.subr.bf16.mxu1 %v1329_v9  ;;  %v1345_v25 = vld [vmem:[#allocation2 + $0xf0] sm:$0xff]   ;;  %v1349_v29 = vld [vmem:[#allocation2 + $0xf8] sm:$0xff]   ;;  %v1357_v35 = vld [vmem:[%s1691_s0 + $0xc] ss:$20 sps:$4 sm:$0xff]  }
  0x1c   :  { %v1346_v26 = vld [vmem:[#allocation2 + $0x30] sm:$0xff]   ;;  %v1350_v30 = vld [vmem:[#allocation2 + $0x38] sm:$0xff]   ;;  %v1358_v36 = vld [vmem:[#allocation2 + $0x100] sm:$0xff]   ;;  %770 = vmatprep.mubr.bf16.mxu1 %v1357_v35 }
  0x1d   :  { %1129 = vmatpush3.bf16.msra.mxu0 %v1330_v10  ;;  %v1347_v27 = vld [vmem:[#allocation2 + $0xb0] sm:$0xff]   ;;  %v1351_v31 = vld [vmem:[#allocation2 + $0xb8] sm:$0xff]   ;;  %v1359_v37 = vld [vmem:[%s1691_s0 + $0x2c] ss:$20 sps:$4 sm:$0xff]  }
  0x1e   :  { %1193 = vmatpush3.bf16.msra.mxu1 %v1331_v11  ;;  %1130 = vmatprep.subr.bf16.mxu0 %v1332_v12  ;;  %v1352_v32 = vld [vmem:[%s1691_s0] ss:$20 sps:$4 sm:$0xff]   ;;  %v1354_v33 = vld [vmem:[%s1691_s0 + $0x4] ss:$20 sps:$4 sm:$0xff]   ;;  %v1355_v34 = vld [vmem:[%s1691_s0 + $0x8] ss:$20 sps:$4 sm:$0xff]  }
  0x1f   :  { %1194 = vmatprep.subr.bf16.mxu1 %v1333_v13  ;;  %673 = vmatprep.mubr.bf16.mxu0 %v1354_v33  ;;  %v1361_v38 = vld [vmem:[%s1691_s0 + $0x34] ss:$20 sps:$4 sm:$0xff]   ;;  %v1364_v41 = vld [vmem:[%s1691_s0 + $0x30] ss:$20 sps:$4 sm:$0xff]   ;;  %v1379_v45 = vld [vmem:[#allocation2 + $0x118] sm:$0xff]  }
  0x20   :  { %v1365_v39 = vld [vmem:[#allocation2 + $0x108] sm:$0xff]   ;;  %v1368_v43 = vld [vmem:[%s1691_s0 + $0x5c] ss:$20 sps:$4 sm:$0xff]   ;;  %v1375_v49 = vld [vmem:[%s1691_s0 + $0x84] ss:$20 sps:$4 sm:$0xff]  }
  0x21   :  { %1131 = vmatpush3.bf16.msra.mxu0 %v1334_v14  ;;  %v1363_v40 = vld [vmem:[%s1691_s0 + $0x28] ss:$20 sps:$4 sm:$0xff]   ;;  %v1372_v44 = vld [vmem:[#allocation2 + $0x110] sm:$0xff]   ;;  %v1371_v47 = vld [vmem:[%s1691_s0 + $0x58] ss:$20 sps:$4 sm:$0xff]  }
  0x22   :  { %1195 = vmatpush3.bf16.msra.mxu1 %v1335_v15  ;;  %1132 = vmatprep.subr.bf16.mxu0 %v1336_v16  ;;  %v1366_v42 = vld [vmem:[%s1691_s0 + $0x54] ss:$20 sps:$4 sm:$0xff]   ;;  %v1370_v46 = vld [vmem:[%s1691_s0 + $0x50] ss:$20 sps:$4 sm:$0xff]   ;;  %v1377_v52 = vld [vmem:[%s1691_s0 + $0x78] ss:$20 sps:$4 sm:$0xff]  }
  0x23   :  { %1196 = vmatprep.subr.bf16.mxu1 %v1337_v17  ;;  %v1373_v48 = vld [vmem:[%s1691_s0 + $0x7c] ss:$20 sps:$4 sm:$0xff]   ;;  %v1386_v50 = vld [vmem:[#allocation2 + $0x120] sm:$0xff]   ;;  %v1393_v51 = vld [vmem:[#allocation2 + $0x128] sm:$0xff]  }
  0x24   :  { %v1378_v53 = vld [vmem:[%s1691_s0 + $0x80] ss:$20 sps:$4 sm:$0xff]   ;;  %v1380_v54 = vld [vmem:[%s1691_s0 + $0xa4] ss:$20 sps:$4 sm:$0xff]   ;;  %v1385_v59 = vld [vmem:[%s1691_s0 + $0xa8] ss:$20 sps:$4 sm:$0xff]  }
  0x25   :  { %1133 = vmatpush3.bf16.msra.mxu0 %v1338_v18  ;;  %v1400_v55 = vld [vmem:[#allocation2 + $0x130] sm:$0xff]   ;;  %v1382_v56 = vld [vmem:[%s1691_s0 + $0xac] ss:$20 sps:$4 sm:$0xff]   ;;  %v1407_v57 = vld [vmem:[#allocation2 + $0x138] sm:$0xff]  }
  0x26   :  { %1197 = vmatpush3.bf16.msra.mxu1 %v1339_v19  ;;  %1134 = vmatprep.subr.bf16.mxu0 %v1340_v20  ;;  %v1384_v58 = vld [vmem:[%s1691_s0 + $0xa0] ss:$20 sps:$4 sm:$0xff]   ;;  %v1391_v62 = vld [vmem:[%s1691_s0 + $0xc8] ss:$20 sps:$4 sm:$0xff]   ;;  %v1392_v63 = vld [vmem:[%s1691_s0 + $0xd0] ss:$20 sps:$4 sm:$0xff]  }
  0x27   :  { %1198 = vmatprep.subr.bf16.mxu1 %v1341_v21  ;;  %v1387_v60 = vld [vmem:[%s1691_s0 + $0xcc] ss:$20 sps:$4 sm:$0xff]   ;;  %v1389_v61 = vld [vmem:[%s1691_s0 + $0xd4] ss:$20 sps:$4 sm:$0xff]   ;;  %v1396_v1 = vld [vmem:[%s1691_s0 + $0xfc] ss:$20 sps:$4 sm:$0xff]  }
  0x28   :  { %v1394_v0 = vld [vmem:[%s1691_s0 + $0xf4] ss:$20 sps:$4 sm:$0xff]   ;;  %v1398_v2 = vld [vmem:[%s1691_s0 + $0xf0] ss:$20 sps:$4 sm:$0xff]   ;;  %v1399_v3 = vld [vmem:[%s1691_s0 + $0xf8] ss:$20 sps:$4 sm:$0xff]  }
  0x29   :  { %1135 = vmatpush3.bf16.msra.mxu0 %v1342_v22  ;;  %v1401_v4 = vld [vmem:[%s1691_s0 + $0x11c] ss:$20 sps:$4 sm:$0xff]   ;;  %v1403_v5 = vld [vmem:[%s1691_s0 + $0x124] ss:$20 sps:$4 sm:$0xff]   ;;  %v1406_v7 = vld [vmem:[%s1691_s0 + $0x120] ss:$20 sps:$4 sm:$0xff]  }
  0x2a   :  { %1199 = vmatpush3.bf16.msra.mxu1 %v1343_v23  ;;  %1136 = vmatprep.subr.bf16.mxu0 %v1344_v24  ;;  %v1405_v6 = vld [vmem:[%s1691_s0 + $0x118] ss:$20 sps:$4 sm:$0xff]   ;;  %v1408_v8 = vld [vmem:[%s1691_s0 + $0x10] ss:$20 sps:$4 sm:$0xff]   ;;  %v1412_v12 = vld [vmem:[%s1691_s0 + $0x60] ss:$20 sps:$4 sm:$0xff]  }
  0x2b   :  { %1200 = vmatprep.subr.bf16.mxu1 %v1345_v25  ;;  %v1409_v9 = vld [vmem:[%s1691_s0 + $0xb0] ss:$20 sps:$4 sm:$0xff]   ;;  %v1410_v10 = vld [vmem:[%s1691_s0 + $0x38] ss:$20 sps:$4 sm:$0xff]   ;;  %v1413_v13 = vld [vmem:[%s1691_s0 + $0x100] ss:$20 sps:$4 sm:$0xff]  }
  0x2c   :  { %v1411_v11 = vld [vmem:[%s1691_s0 + $0xd8] ss:$20 sps:$4 sm:$0xff]   ;;  %v1414_v14 = vld [vmem:[%s1691_s0 + $0x88] ss:$20 sps:$4 sm:$0xff]  }
  0x2d   :  { %1137 = vmatpush3.bf16.msra.mxu0 %v1346_v26  ;;  %v1415_v15 = vld [vmem:[%s1691_s0 + $0x128] ss:$20 sps:$4 sm:$0xff]  }
  0x2e   :  { %1201 = vmatpush3.bf16.msra.mxu1 %v1347_v27  ;;  %1138 = vmatprep.subr.bf16.mxu0 %v1348_v28 }
  0x2f   :  { %1202 = vmatprep.subr.bf16.mxu1 %v1349_v29 }
  0x31   :  { %1139 = vmatpush3.bf16.msra.mxu0 %v1350_v30 }
  0x32   :  { %1203 = vmatpush3.bf16.msra.mxu1 %v1351_v31  ;;  %1268 = vmatprep.subr.bf16.mxu0 %v1358_v36 }
  0x33   :  { %1300 = vmatprep.subr.bf16.mxu1 %v1358_v36 }
  0x34   :  { %674 = vmatmul.mubr.bf16.vlgmr.msra.gmra.mrb[0].mxu0 %v1352_v32 }
  0x35   :  { %771 = vmatmul.mubr.bf16.vlgmr.msra.gmra.mrb[0].mxu1 %v1355_v34  ;;  %1269 = vmatpush3.bf16.msra.mxu0 %v1358_v36 }
  0x36   :  { %1308 = vmatpush3.bf16.msra.mxu1 %v1358_v36  ;;  %681 = vmatprep.mubr.bf16.mxu0 %v1359_v37 }
  0x37   :  { %778 = vmatprep.mubr.bf16.mxu1 %v1361_v38  ;;  %1270 = vmatprep.subr.bf16.mxu0 %v1365_v39 }
  0x38   :  { %1301 = vmatprep.subr.bf16.mxu1 %v1365_v39 }
  0x39   :  { %1271 = vmatpush3.bf16.msra.mxu0 %v1365_v39 }
  0x3a   :  { %1309 = vmatpush3.bf16.msra.mxu1 %v1365_v39  ;;  %1272 = vmatprep.subr.bf16.mxu0 %v1372_v44 }
  0x3b   :  { %1302 = vmatprep.subr.bf16.mxu1 %v1372_v44 }
  0x3c   :  { %682 = vmatmul.mubr.bf16.gmra.mrb[4].mxu0 %v1363_v40 }
  0x3d   :  { %779 = vmatmul.mubr.bf16.gmra.mrb[4].mxu1 %v1364_v41  ;;  %689 = vmatprep.mubr.bf16.mxu0 %v1366_v42 }
  0x3e   :  { %786 = vmatprep.mubr.bf16.mxu1 %v1368_v43  ;;  %1273 = vmatpush3.bf16.msra.mxu0 %v1372_v44 }
  0x3f   :  { %1310 = vmatpush3.bf16.msra.mxu1 %v1372_v44  ;;  %1274 = vmatprep.subr.bf16.mxu0 %v1379_v45 }
  0x40   :  { %1303 = vmatprep.subr.bf16.mxu1 %v1379_v45 }
  0x42   :  { %1275 = vmatpush3.bf16.msra.mxu0 %v1379_v45 }
  0x43   :  { %1311 = vmatpush3.bf16.msra.mxu1 %v1379_v45  ;;  %1276 = vmatprep.subr.bf16.mxu0 %v1386_v50 }
  0x44   :  { %690 = vmatmul.mubr.bf16.gmra.mrb[8].mxu0 %v1370_v46  ;;  %1304 = vmatprep.subr.bf16.mxu1 %v1386_v50 }
  0x45   :  { %787 = vmatmul.mubr.bf16.gmra.mrb[8].mxu1 %v1371_v47  ;;  %697 = vmatprep.mubr.bf16.mxu0 %v1373_v48 }
  0x46   :  { %794 = vmatprep.mubr.bf16.mxu1 %v1375_v49  ;;  %1277 = vmatpush3.bf16.msra.mxu0 %v1386_v50 }
  0x47   :  { %1312 = vmatpush3.bf16.msra.mxu1 %v1386_v50  ;;  %1278 = vmatprep.subr.bf16.mxu0 %v1393_v51 }
  0x48   :  { %1305 = vmatprep.subr.bf16.mxu1 %v1393_v51 }
  0x4a   :  { %1279 = vmatpush3.bf16.msra.mxu0 %v1393_v51 }
  0x4b   :  { %1313 = vmatpush3.bf16.msra.mxu1 %v1393_v51  ;;  %1280 = vmatprep.subr.bf16.mxu0 %v1400_v55 }
  0x4c   :  { %698 = vmatmul.mubr.bf16.gmra.mrb[12].mxu0 %v1377_v52  ;;  %1306 = vmatprep.subr.bf16.mxu1 %v1400_v55 }
  0x4d   :  { %795 = vmatmul.mubr.bf16.gmra.mrb[12].mxu1 %v1378_v53  ;;  %705 = vmatprep.mubr.bf16.mxu0 %v1380_v54 }
  0x4e   :  { %802 = vmatprep.mubr.bf16.mxu1 %v1382_v56  ;;  %1281 = vmatpush3.bf16.msra.mxu0 %v1400_v55 }
  0x4f   :  { %1314 = vmatpush3.bf16.msra.mxu1 %v1400_v55  ;;  %1282 = vmatprep.subr.bf16.mxu0 %v1407_v57 }
  0x50   :  { %1307 = vmatprep.subr.bf16.mxu1 %v1407_v57 }
  0x52   :  { %1283 = vmatpush3.bf16.msra.mxu0 %v1407_v57 }
  0x53   :  { %1315 = vmatpush3.bf16.msra.mxu1 %v1407_v57 }
  0x54   :  { %706 = vmatmul.mubr.bf16.gmra.mrb[16].mxu0 %v1384_v58 }
  0x55   :  { %803 = vmatmul.mubr.bf16.gmra.mrb[16].mxu1 %v1385_v59  ;;  %713 = vmatprep.mubr.bf16.mxu0 %v1387_v60 }
  0x56   :  { %810 = vmatprep.mubr.bf16.mxu1 %v1389_v61 }
  0x5c   :  { %714 = vmatmul.mubr.bf16.gmra.mrb[20].mxu0 %v1391_v62 }
  0x5d   :  { %811 = vmatmul.mubr.bf16.gmra.mrb[20].mxu1 %v1392_v63  ;;  %721 = vmatprep.mubr.bf16.mxu0 %v1394_v0 }
  0x5e   :  { %818 = vmatprep.mubr.bf16.mxu1 %v1396_v1 }
  0x64   :  { %722 = vmatmul.mubr.bf16.gmra.mrb[24].mxu0 %v1398_v2 }
  0x65   :  { %819 = vmatmul.mubr.bf16.gmra.mrb[24].mxu1 %v1399_v3  ;;  %729 = vmatprep.mubr.bf16.mxu0 %v1401_v4 }
  0x66   :  { %826 = vmatprep.mubr.bf16.mxu1 %v1403_v5 }
  0x6c   :  { %730 = vmatmul.mubr.bf16.gmra.mrb[28].mxu0 %v1405_v6 }
  0x6d   :  { %827 = vmatmul.mubr.bf16.gmra.mrb[28].mxu1 %v1406_v7  ;;  %1284 = vmatprep.mubr.bf16.mxu0 %v1408_v8 }
  0x6e   :  { %1292 = vmatprep.mubr.bf16.mxu1 %v1409_v9 }
  0x74   :  { %1285 = vmatmul.mubr.bf16.vlgmr.msra.gmra.mrb[32].mxu0 %v1410_v10 }
  0x75   :  { %1293 = vmatmul.mubr.bf16.vlgmr.msra.gmra.mrb[32].mxu1 %v1411_v11  ;;  %1288 = vmatprep.mubr.bf16.mxu0 %v1412_v12 }
  0x76   :  { %1296 = vmatprep.mubr.bf16.mxu1 %v1413_v13 }
  0x7c   :  { %1289 = vmatmul.mubr.bf16.gmra.mrb[36].mxu0 %v1414_v14 }
  0x7d   :  { %1297 = vmatmul.mubr.bf16.gmra.mrb[36].mxu1 %v1415_v15 }
 0x107   :  { %v1140_v16 = vpop.f32.mrb[0].mxu0 }
 0x108   :  { %v1204_v17 = vpop.f32.mrb[0].mxu1  ;;  %v1141_v18 = vpop.f32.mrb[1].mxu0 }
 0x109   :  { %v1142_v19 = vadd.f32 %v1141_v18, %v1140_v16  ;;  %v1205_v20 = vpop.f32.mrb[1].mxu1  ;;  %v1143_v21 = vpop.f32.mrb[2].mxu0 }
 0x10a   :  { %v1206_v22 = vadd.f32 %v1205_v20, %v1204_v17  ;;  %v1207_v23 = vpop.f32.mrb[2].mxu1  ;;  %v1144_v24 = vpop.f32.mrb[3].mxu0 }
 0x10b   :  { %v1145_v25 = vadd.f32 %v1144_v24, %v1143_v21  ;;  %v1208_v26 = vpop.f32.mrb[3].mxu1 }
 0x10c   :  { %v1209_v27 = vadd.f32 %v1208_v26, %v1207_v23  ;;  %v1595_v28 = vadd.f32 %v1206_v22, %v1142_v19 }
 0x10e   :  { %v1597_v29 = vadd.f32 %v1209_v27, %v1145_v25 }
 0x10f   :  { %v1146_v30 = vpop.f32.mrb[4].mxu0 }
 0x110   :  { %v1210_v31 = vpop.f32.mrb[4].mxu1  ;;  %v1147_v32 = vpop.f32.mrb[5].mxu0 }
 0x111   :  { %v1148_v33 = vadd.f32 %v1147_v32, %v1146_v30  ;;  %v1211_v34 = vpop.f32.mrb[5].mxu1  ;;  %v1149_v35 = vpop.f32.mrb[6].mxu0 }
 0x112   :  { %v1212_v36 = vadd.f32 %v1211_v34, %v1210_v31  ;;  %v1213_v37 = vpop.f32.mrb[6].mxu1  ;;  %v1150_v38 = vpop.f32.mrb[7].mxu0 }
 0x113   :  { %v1151_v39 = vadd.f32 %v1150_v38, %v1149_v35  ;;  %v1214_v40 = vpop.f32.mrb[7].mxu1 }
 0x114   :  { %v1215_v41 = vadd.f32 %v1214_v40, %v1213_v37  ;;  %v1599_v42 = vadd.f32 %v1212_v36, %v1148_v33 }
 0x116   :  { %v1601_v43 = vadd.f32 %v1215_v41, %v1151_v39 }
 0x117   :  { %v1152_v44 = vpop.f32.mrb[8].mxu0 }
 0x118   :  { %v1216_v45 = vpop.f32.mrb[8].mxu1  ;;  %v1153_v46 = vpop.f32.mrb[9].mxu0 }
 0x119   :  { %v1154_v47 = vadd.f32 %v1153_v46, %v1152_v44  ;;  %v1217_v48 = vpop.f32.mrb[9].mxu1  ;;  %v1155_v49 = vpop.f32.mrb[10].mxu0 }
 0x11a   :  { %v1218_v50 = vadd.f32 %v1217_v48, %v1216_v45  ;;  %v1219_v51 = vpop.f32.mrb[10].mxu1  ;;  %v1156_v52 = vpop.f32.mrb[11].mxu0 }
 0x11b   :  { %v1157_v53 = vadd.f32 %v1156_v52, %v1155_v49  ;;  %v1220_v54 = vpop.f32.mrb[11].mxu1 }
 0x11c   :  { %v1221_v55 = vadd.f32 %v1220_v54, %v1219_v51  ;;  %v1603_v56 = vadd.f32 %v1218_v50, %v1154_v47 }
 0x11e   :  { %v1605_v57 = vadd.f32 %v1221_v55, %v1157_v53 }
 0x11f   :  { %v1158_v58 = vpop.f32.mrb[12].mxu0 }
 0x120   :  { %v1222_v59 = vpop.f32.mrb[12].mxu1  ;;  %v1159_v60 = vpop.f32.mrb[13].mxu0 }
 0x121   :  { %v1160_v61 = vadd.f32 %v1159_v60, %v1158_v58  ;;  %v1223_v62 = vpop.f32.mrb[13].mxu1  ;;  %v1161_v63 = vpop.f32.mrb[14].mxu0 }
 0x122   :  { %v1224_v0 = vadd.f32 %v1223_v62, %v1222_v59  ;;  %v1225_v1 = vpop.f32.mrb[14].mxu1  ;;  %v1162_v2 = vpop.f32.mrb[15].mxu0 }
 0x123   :  { %v1163_v3 = vadd.f32 %v1162_v2, %v1161_v63  ;;  %v1226_v4 = vpop.f32.mrb[15].mxu1 }
 0x124   :  { %v1227_v5 = vadd.f32 %v1226_v4, %v1225_v1  ;;  %v1607_v6 = vadd.f32 %v1224_v0, %v1160_v61 }
 0x126   :  { %v1609_v7 = vadd.f32 %v1227_v5, %v1163_v3 }
 0x127   :  { %v1164_v8 = vpop.f32.mrb[16].mxu0 }
 0x128   :  { %v1228_v9 = vpop.f32.mrb[16].mxu1  ;;  %v1165_v10 = vpop.f32.mrb[17].mxu0 }
 0x129   :  { %v1166_v11 = vadd.f32 %v1165_v10, %v1164_v8  ;;  %v1229_v12 = vpop.f32.mrb[17].mxu1  ;;  %v1167_v13 = vpop.f32.mrb[18].mxu0 }
 0x12a   :  { %v1230_v14 = vadd.f32 %v1229_v12, %v1228_v9  ;;  %v1231_v15 = vpop.f32.mrb[18].mxu1  ;;  %v1168_v16 = vpop.f32.mrb[19].mxu0  ;;  %v1617_v12 = vld [vmem:[%s1693_s2] ss:$0 sm:$0xff] }
 0x12b   :  { %v1169_v17 = vadd.f32 %v1168_v16, %v1167_v13  ;;  %v1232_v18 = vpop.f32.mrb[19].mxu1 }
 0x12c   :  { %v1233_v19 = vadd.f32 %v1232_v18, %v1231_v15  ;;  %v805_v20 = vadd.f32 %v1230_v14, %v1166_v11 }
 0x12e   :  { %v808_v21 = vadd.f32 %v1233_v19, %v1169_v17 }
 0x12f   :  { %v1170_v22 = vpop.f32.mrb[20].mxu0 }
 0x130   :  { %v1234_v23 = vpop.f32.mrb[20].mxu1  ;;  %v1171_v24 = vpop.f32.mrb[21].mxu0 }
 0x131   :  { %v1172_v25 = vadd.f32 %v1171_v24, %v1170_v22  ;;  %v1235_v26 = vpop.f32.mrb[21].mxu1  ;;  %v1173_v27 = vpop.f32.mrb[22].mxu0 }
 0x132   :  { %v1236_v30 = vadd.f32 %v1235_v26, %v1234_v23  ;;  %v1237_v31 = vpop.f32.mrb[22].mxu1  ;;  %v1174_v32 = vpop.f32.mrb[23].mxu0 }
 0x133   :  { %v1175_v33 = vadd.f32 %v1174_v32, %v1173_v27  ;;  %v1238_v34 = vpop.f32.mrb[23].mxu1 }
 0x134   :  { %v1239_v35 = vadd.f32 %v1238_v34, %v1237_v31  ;;  %v813_v36 = vadd.f32 %v1236_v30, %v1172_v25 }
 0x136   :  { %v816_v37 = vadd.f32 %v1239_v35, %v1175_v33 }
 0x137   :  { %v1176_v38 = vpop.f32.mrb[24].mxu0 }
 0x138   :  { %v1240_v39 = vpop.f32.mrb[24].mxu1  ;;  %v1177_v40 = vpop.f32.mrb[25].mxu0 }
 0x139   :  { %v1178_v41 = vadd.f32 %v1177_v40, %v1176_v38  ;;  %v1241_v44 = vpop.f32.mrb[25].mxu1  ;;  %v1179_v45 = vpop.f32.mrb[26].mxu0 }
 0x13a   :  { %v1242_v46 = vadd.f32 %v1241_v44, %v1240_v39  ;;  %v1243_v47 = vpop.f32.mrb[26].mxu1  ;;  %v1180_v48 = vpop.f32.mrb[27].mxu0 }
 0x13b   :  { %v1181_v49 = vadd.f32 %v1180_v48, %v1179_v45  ;;  %v1244_v50 = vpop.f32.mrb[27].mxu1 }
 0x13c   :  { %v1245_v51 = vadd.f32 %v1244_v50, %v1243_v47  ;;  %v821_v52 = vadd.f32 %v1242_v46, %v1178_v41 }
 0x13e   :  { %v1611_v53 = vadd.f32 %v1245_v51, %v1181_v49 }
 0x13f   :  { %v1182_v54 = vpop.f32.mrb[28].mxu0 }
 0x140   :  { %v1246_v55 = vpop.f32.mrb[28].mxu1  ;;  %v1183_v58 = vpop.f32.mrb[29].mxu0 }
 0x141   :  { %v1184_v59 = vadd.f32 %v1183_v58, %v1182_v54  ;;  %v1247_v60 = vpop.f32.mrb[29].mxu1  ;;  %v1185_v61 = vpop.f32.mrb[30].mxu0 }
 0x142   :  { %v1248_v62 = vadd.f32 %v1247_v60, %v1246_v55  ;;  %v1249_v63 = vpop.f32.mrb[30].mxu1  ;;  %v1186_v0 = vpop.f32.mrb[31].mxu0 }
 0x143   :  { %v1187_v1 = vadd.f32 %v1186_v0, %v1185_v61  ;;  %v1250_v2 = vpop.f32.mrb[31].mxu1 }
 0x144   :  { %v1251_v3 = vadd.f32 %v1250_v2, %v1249_v63  ;;  %v829_v4 = vadd.f32 %v1248_v62, %v1184_v59 }
 0x146   :  { %v832_v5 = vadd.f32 %v1251_v3, %v1187_v1 }
 0x147   :  { %v1286_v8 = vpop.f32.mrb[32].mxu0 }
 0x148   :  { %v878_v9 = vadd.f32 %v1286_v8, %v1599_v42  ;;  %v1294_v10 = vpop.f32.mrb[32].mxu1  ;;  %v869_v11 = vpop.f32.mrb[33].mxu0 }
 0x149   :  { %v910_v13 = vadd.f32 %v1294_v10, %v813_v36  ;;  %v870_v14 = vadd.f32 %v869_v11, %v1595_v28  ;;  %v901_v15 = vpop.f32.mrb[33].mxu1  ;;  %v1287_v16 = vpop.f32.mrb[34].mxu0 }
 0x14a   :  { %v902_v17 = vadd.f32 %v901_v15, %v805_v20  ;;  %v881_v18 = vadd.f32 %v1287_v16, %v1601_v43  ;;  %v1295_v19 = vpop.f32.mrb[34].mxu1  ;;  %v872_v22 = vpop.f32.mrb[35].mxu0  ;;  %v992_v25 = vadd.f32 %v1617_v12, %v878_v9 }
 0x14b   :  { %v913_v23 = vadd.f32 %v1295_v19, %v816_v37  ;;  %v873_v42 = vadd.f32 %v872_v22, %v1597_v29  ;;  %v904_v24 = vpop.f32.mrb[35].mxu1  ;;  %v1000_v27 = vadd.f32 %v1617_v12, %v910_v13  ;;  %v990_v30 = vadd.f32 %v1617_v12, %v870_v14 }
 0x14c   :  { %v905_v26 = vadd.f32 %v904_v24, %v808_v21  ;;  %v1008_v31 = vmax.f32 %v992_v25, 0.0  ;;  %v998_v28 = vadd.f32 %v1617_v12, %v902_v17  ;;  %v993_v20 = vadd.f32 %v1617_v12, %v881_v18 }
 0x14d   :  { %v1016_v32 = vmax.f32 %v1000_v27, 0.0  ;;  %v1006_v43 = vmax.f32 %v990_v30, 0.0  ;;  %v1001_v33 = vadd.f32 %v1617_v12, %v913_v23  ;;  %v991_v34 = vadd.f32 %v1617_v12, %v873_v42 }
 0x14e   :  { %1024 = vst [vmem:[%s1694_s3 + $0x10] sm:$0xff] %v1008_v31  ;;  %v1014_v21 = vmax.f32 %v998_v28, 0.0  ;;  %v1009_v35 = vmax.f32 %v993_v20, 0.0  ;;  %v999_v36 = vadd.f32 %v1617_v12, %v905_v26 }
 0x14f   :  { %v1290_v29 = vpop.f32.mrb[36].mxu0  ;;  %1032 = vst [vmem:[%s1694_s3 + $0x50] sm:$0xff] %v1016_v32  ;;  %1022 = vst [vmem:[%s1694_s3] sm:$0xff] %v1006_v43  ;;  %v1017_v40 = vmax.f32 %v1001_v33, 0.0  ;;  %v1007_v41 = vmax.f32 %v991_v34, 0.0 }
 0x150   :  { %v894_v37 = vadd.f32 %v1290_v29, %v1607_v6  ;;  %v1298_v38 = vpop.f32.mrb[36].mxu1  ;;  %v885_v39 = vpop.f32.mrb[37].mxu0  ;;  %1030 = vst [vmem:[%s1694_s3 + $0x40] sm:$0xff] %v1014_v21  ;;  %1025 = vst [vmem:[%s1694_s3 + $0x18] sm:$0xff] %v1009_v35  ;;  %v1015_v6 = vmax.f32 %v999_v36, 0.0 }
 0x151   :  { %v926_v44 = vadd.f32 %v1298_v38, %v829_v4  ;;  %v886_v45 = vadd.f32 %v885_v39, %v1603_v56  ;;  %v917_v46 = vpop.f32.mrb[37].mxu1  ;;  %v1291_v47 = vpop.f32.mrb[38].mxu0  ;;  %1033 = vst [vmem:[%s1694_s3 + $0x58] sm:$0xff] %v1017_v40  ;;  %1023 = vst [vmem:[%s1694_s3 + $0x8] sm:$0xff] %v1007_v41 }
 0x152   :  { %v918_v48 = vadd.f32 %v917_v46, %v821_v52  ;;  %v897_v49 = vadd.f32 %v1291_v47, %v1609_v7  ;;  %v1299_v50 = vpop.f32.mrb[38].mxu1  ;;  %v888_v51 = vpop.f32.mrb[39].mxu0  ;;  %1031 = vst [vmem:[%s1694_s3 + $0x48] sm:$0xff] %v1015_v6  ;;  %v996_v7 = vadd.f32 %v1617_v12, %v894_v37 }
 0x153   :  { %v929_v56 = vadd.f32 %v1299_v50, %v832_v5  ;;  %v889_v54 = vadd.f32 %v888_v51, %v1605_v57  ;;  %v920_v55 = vpop.f32.mrb[39].mxu1  ;;  %v1004_v58 = vadd.f32 %v1617_v12, %v926_v44  ;;  %v994_v59 = vadd.f32 %v1617_v12, %v886_v45 }
 0x154   :  { %v921_v52 = vadd.f32 %v920_v55, %v1611_v53  ;;  %v1012_v60 = vmax.f32 %v996_v7, 0.0  ;;  %v1002_v61 = vadd.f32 %v1617_v12, %v918_v48  ;;  %v997_v62 = vadd.f32 %v1617_v12, %v897_v49 }
 0x155   :  { %v1020_v63 = vmax.f32 %v1004_v58, 0.0  ;;  %v1010_v57 = vmax.f32 %v994_v59, 0.0  ;;  %v1005_v0 = vadd.f32 %v1617_v12, %v929_v56  ;;  %v995_v1 = vadd.f32 %v1617_v12, %v889_v54 }
 0x156   :  { %1028 = vst [vmem:[%s1694_s3 + $0x30] sm:$0xff] %v1012_v60  ;;  %v1018_v53 = vmax.f32 %v1002_v61, 0.0  ;;  %v1013_v2 = vmax.f32 %v997_v62, 0.0  ;;  %v1003_v3 = vadd.f32 %v1617_v12, %v921_v52 }
 0x157   :  { %1036 = vst [vmem:[%s1694_s3 + $0x70] sm:$0xff] %v1020_v63  ;;  %1026 = vst [vmem:[%s1694_s3 + $0x20] sm:$0xff] %v1010_v57  ;;  %v1021_v4 = vmax.f32 %v1005_v0, 0.0  ;;  %v1011_v5 = vmax.f32 %v995_v1, 0.0 }
 0x158   :  { %1034 = vst [vmem:[%s1694_s3 + $0x60] sm:$0xff] %v1018_v53  ;;  %1029 = vst [vmem:[%s1694_s3 + $0x38] sm:$0xff] %v1013_v2  ;;  %v1019_v8 = vmax.f32 %v1003_v3, 0.0 }
 0x159   :  { %1037 = vst [vmem:[%s1694_s3 + $0x78] sm:$0xff] %v1021_v4  ;;  %1027 = vst [vmem:[%s1694_s3 + $0x28] sm:$0xff] %v1011_v5 }
 0x15a   :  { %1035 = vst [vmem:[%s1694_s3 + $0x68] sm:$0xff] %v1019_v8 }
 0x15b   :  { %1042 = vsyncpa [#allocation3], 1 }

// kernel: acrlsd_forward.10
= control target key start
LH: loop header
LB: loop body
LE: loop exit
PB: predicated region body
PF: predicated region fallthrough
CT: control target
= control target key end

     0   :  { %s1625_s12 = smov 0   ;;  %s1627_s13 = smov 0   ;;  %s2071_s0 = inlined_call_operand.vmem [shape: bf16[128,3584], index: 0, kind: input, shape index: {}]   ;;  %s2072_s1 = inlined_call_operand.vmem [shape: bf16[3584,128], index: 1, kind: input, shape index: {}]   ;;  %s2073_s2 = inlined_call_operand.vmem [shape: f32[1,128], index: 2, kind: input, shape index: {}]   ;;  %s2074_s3 = inlined_call_operand.vmem [shape: f32[128,128], index: 3, kind: output, shape index: {}]  }
   0x1   :  { %s1629_s14 = smov 0   ;;  %s1631_s15 = smov 0  }
   0x2   :  { %s1633_s16 = smov 0  }
   0x3 LB: > { %s25_s17 = sadd.s32 1, %s1598_s15  ;;  %p48_p1 = scmp.ne.s32.totalorder %s1590_s13, %s1586_s12  ;;  %s1602_s16 = sphi %s1633_s16, %s13_s16   ;;  %s1598_s15 = sphi %s1631_s15, %s2078_s15   ;;  %s1594_s14 = sphi %s1629_s14, %s2077_s14   ;;  %s1590_s13 = sphi %s1627_s13, %s2076_s13   ;;  %s1586_s12 = sphi %s1625_s12, %s2075_s12  }
   0x4   : > { %p26_p0 = scmp.ge.s32.totalorder %s25_s17, 7  ;;  %p49_p2 = scmp.eq.s32.totalorder %s1602_s16, 0 }
   0x5   : > { %s41_s19 = sadd.s32 1, %s1590_s13  ;;  %p1235_p5 = scmp.ge.s32.totalorder %s1602_s16, 7 }
   0x6   : > { %s2080_s17 = smov (%p26_p0, %s25_s17), 0  ;;  %p50_p3 = por %p49_p2, %p48_p1 }
   0x7   : > { %s37_s18 = ssub.s32 %s1598_s15, %s2080_s17  ;;  %162 = sbr.rel (%p1235_p5) target bundleno = 34 (0x22), region = 20 }
   0x8   : > { %p39_p4 = scmp.eq.s32.totalorder %s37_s18, 0 }
   0xa   : > { %s1660_s20 = scalar_select %p39_p4, %s1590_s13, %s41_s19  }
   0xe   : > { %165 = sbr.rel (!%p50_p3) target bundleno = 34 (0x22), region = 24  ;;  %s167_s21 = sand.u32 (%p50_p3), 1, %s1590_s13  }
   0xf   : > { %s1314_s22 = sshll.u32 (%p50_p3), %s1598_s15, 4  ;;  %s1236_s23 = sshll.u32 (%p50_p3), %s167_s21, 8 }
  0x10   : > { %s1668_s26 = scalar_lea.vmem (%p50_p3), %s2071_s0, %s1314_s22  ;;  %s1673_s27 = scalar_lea.vmem (%p50_p3), [#allocation2], %s1236_s23 }
  0x11   : > { %v188_v0 = vld [vmem:[%s1668_s26] sm:$0xff] (%p50_p3)  ;;  %v190_v1 = vld [vmem:[%s1668_s26 + $0x8] sm:$0xff] (%p50_p3)  ;;  %v192_v2 = vld [vmem:[%s1668_s26 + $0x70] sm:$0xff] (%p50_p3) }
  0x12   : > { %189 = vst [vmem:[%s1673_s27] sm:$0xff] (%p50_p3), %v188_v0  ;;  %191 = vst [vmem:[%s1673_s27 + $0x8] sm:$0xff] (%p50_p3), %v190_v1  ;;  %v194_v3 = vld [vmem:[%s1668_s26 + $0x78] sm:$0xff] (%p50_p3)  ;;  %v196_v4 = vld [vmem:[%s1668_s26 + $0xe0] sm:$0xff] (%p50_p3) }
  0x13   : > { %193 = vst [vmem:[%s1673_s27 + $0x10] sm:$0xff] (%p50_p3), %v192_v2  ;;  %v198_v5 = vld [vmem:[%s1668_s26 + $0xe8] sm:$0xff] (%p50_p3)  ;;  %195 = vst [vmem:[%s1673_s27 + $0x18] sm:$0xff] (%p50_p3), %v194_v3  ;;  %v200_v6 = vld [vmem:[%s1668_s26 + $0x150] sm:$0xff] (%p50_p3) }
  0x14   : > { %197 = vst [vmem:[%s1673_s27 + $0x20] sm:$0xff] (%p50_p3), %v196_v4  ;;  %199 = vst [vmem:[%s1673_s27 + $0x28] sm:$0xff] (%p50_p3), %v198_v5  ;;  %v202_v7 = vld [vmem:[%s1668_s26 + $0x158] sm:$0xff] (%p50_p3)  ;;  %v204_v8 = vld [vmem:[%s1668_s26 + $0x1c0] sm:$0xff] (%p50_p3) }
  0x15   : > { %201 = vst [vmem:[%s1673_s27 + $0x30] sm:$0xff] %v200_v6  ;;  %203 = vst [vmem:[%s1673_s27 + $0x38] sm:$0xff] %v202_v7  ;;  %v206_v9 = vld [vmem:[%s1668_s26 + $0x1c8] sm:$0xff]  ;;  %v208_v10 = vld [vmem:[%s1668_s26 + $0x230] sm:$0xff] }
  0x16   : > { %205 = vst [vmem:[%s1673_s27 + $0x40] sm:$0xff] %v204_v8  ;;  %v210_v11 = vld [vmem:[%s1668_s26 + $0x238] sm:$0xff]  ;;  %207 = vst [vmem:[%s1673_s27 + $0x48] sm:$0xff] %v206_v9  ;;  %v212_v12 = vld [vmem:[%s1668_s26 + $0x2a0] sm:$0xff] }
  0x17   : > { %209 = vst [vmem:[%s1673_s27 + $0x50] sm:$0xff] %v208_v10  ;;  %211 = vst [vmem:[%s1673_s27 + $0x58] sm:$0xff] %v210_v11  ;;  %v214_v13 = vld [vmem:[%s1668_s26 + $0x2a8] sm:$0xff]  ;;  %v216_v14 = vld [vmem:[%s1668_s26 + $0x310] sm:$0xff] }
  0x18   : > { %213 = vst [vmem:[%s1673_s27 + $0x60] sm:$0xff] %v212_v12  ;;  %215 = vst [vmem:[%s1673_s27 + $0x68] sm:$0xff] %v214_v13  ;;  %v218_v15 = vld [vmem:[%s1668_s26 + $0x318] sm:$0xff]  ;;  %v220_v16 = vld [vmem:[%s1668_s26 + $0x380] sm:$0xff] }
  0x19   : > { %217 = vst [vmem:[%s1673_s27 + $0x70] sm:$0xff] %v216_v14  ;;  %v222_v17 = vld [vmem:[%s1668_s26 + $0x388] sm:$0xff]  ;;  %219 = vst [vmem:[%s1673_s27 + $0x78] sm:$0xff] %v218_v15  ;;  %v224_v18 = vld [vmem:[%s1668_s26 + $0x3f0] sm:$0xff] }
  0x1a   : > { %221 = vst [vmem:[%s1673_s27 + $0x80] sm:$0xff] %v220_v16  ;;  %223 = vst [vmem:[%s1673_s27 + $0x88] sm:$0xff] %v222_v17  ;;  %v226_v19 = vld [vmem:[%s1668_s26 + $0x3f8] sm:$0xff]  ;;  %v228_v20 = vld [vmem:[%s1668_s26 + $0x460] sm:$0xff] }
  0x1b   : > { %225 = vst [vmem:[%s1673_s27 + $0x90] sm:$0xff] %v224_v18  ;;  %227 = vst [vmem:[%s1673_s27 + $0x98] sm:$0xff] %v226_v19  ;;  %v230_v21 = vld [vmem:[%s1668_s26 + $0x468] sm:$0xff]  ;;  %v232_v22 = vld [vmem:[%s1668_s26 + $0x4d0] sm:$0xff] }
  0x1c   : > { %229 = vst [vmem:[%s1673_s27 + $0xa0] sm:$0xff] %v228_v20  ;;  %v234_v23 = vld [vmem:[%s1668_s26 + $0x4d8] sm:$0xff]  ;;  %231 = vst [vmem:[%s1673_s27 + $0xa8] sm:$0xff] %v230_v21  ;;  %v236_v24 = vld [vmem:[%s1668_s26 + $0x540] sm:$0xff] }
  0x1d   : > { %233 = vst [vmem:[%s1673_s27 + $0xb0] sm:$0xff] %v232_v22  ;;  %235 = vst [vmem:[%s1673_s27 + $0xb8] sm:$0xff] %v234_v23  ;;  %v238_v25 = vld [vmem:[%s1668_s26 + $0x548] sm:$0xff]  ;;  %v240_v26 = vld [vmem:[%s1668_s26 + $0x5b0] sm:$0xff] }
  0x1e   : > { %237 = vst [vmem:[%s1673_s27 + $0xc0] sm:$0xff] %v236_v24  ;;  %239 = vst [vmem:[%s1673_s27 + $0xc8] sm:$0xff] %v238_v25  ;;  %v242_v27 = vld [vmem:[%s1668_s26 + $0x5b8] sm:$0xff]  ;;  %v244_v28 = vld [vmem:[%s1668_s26 + $0x620] sm:$0xff] }
  0x1f   : > { %241 = vst [vmem:[%s1673_s27 + $0xd0] sm:$0xff] %v240_v26  ;;  %v246_v29 = vld [vmem:[%s1668_s26 + $0x628] sm:$0xff]  ;;  %243 = vst [vmem:[%s1673_s27 + $0xd8] sm:$0xff] %v242_v27  ;;  %v248_v30 = vld [vmem:[%s1668_s26 + $0x690] sm:$0xff] }
  0x20   : > { %245 = vst [vmem:[%s1673_s27 + $0xe0] sm:$0xff] %v244_v28  ;;  %247 = vst [vmem:[%s1673_s27 + $0xe8] sm:$0xff] %v246_v29  ;;  %v250_v31 = vld [vmem:[%s1668_s26 + $0x698] sm:$0xff] }
  0x21   : > { %249 = vst [vmem:[%s1673_s27 + $0xf0] sm:$0xff] %v248_v30  ;;  %251 = vst [vmem:[%s1673_s27 + $0xf8] sm:$0xff] %v250_v31 }
  0x22 PF: > { %p1239_p6 = scmp.ge.s32.totalorder %s1602_s16, 1  ;;  %p268_p7 = scmp.lt.s32.totalorder %s1602_s16, 8 }
  0x24   : > { %p269_p8 = pnand %p1239_p6, %p268_p7 }
  0x25   : > { %s275_s28 = sand.u32 (!%p269_p8), 1, %s1586_s12   ;;  %s1241_s29 = sshll.u32 (!%p269_p8), %s1594_s14, 6 }
  0x26   : > { %272 = sbr.rel (%p269_p8) target bundleno = 380 (0x17c), region = 51  ;;  %s1240_s30 = sshll.u32 (!%p269_p8), %s275_s28, 8 }
  0x27   : > { %p315_p9 = scmp.lt.s32.totalorder (!%p269_p8), %s1241_s29, 447  ;;  %s1745_s8 = scalar_lea.vmem (!%p269_p8), [#allocation2], %s1240_s30 }
  0x28   : > { %p1243_p10 = scmp.ne.s32.totalorder (!%p269_p8), %s1594_s14, 0 }
  0x2d   : > { %s2082_s29 = smov (!%p315_p9, %s1241_s29), 447  ;;  %339 = sbr.rel (%p1243_p10) target bundleno = 55 (0x37), region = 59 }
  0x2e   : > { %s1242_s4 = sshll.u32 %s2082_s29, 2  ;;  %v1604_v32 = vmov (!%p1243_p10), 0.0  }
  0x2f   : > { %s1743_s7 = scalar_lea.vmem %s2072_s1, %s1242_s4  ;;  %340 = vst [vmem:[%s2074_s3] sm:$0xff] (!%p1243_p10), %v1604_v32  ;;  %341 = vst [vmem:[%s2074_s3 + $0x8] sm:$0xff] (!%p1243_p10), %v1604_v32 }
  0x30   : > { %342 = vst [vmem:[%s2074_s3 + $0x10] sm:$0xff] (!%p1243_p10), %v1604_v32  ;;  %343 = vst [vmem:[%s2074_s3 + $0x18] sm:$0xff] (!%p1243_p10), %v1604_v32 }
  0x31   : > { %344 = vst [vmem:[%s2074_s3 + $0x20] sm:$0xff] (!%p1243_p10), %v1604_v32  ;;  %345 = vst [vmem:[%s2074_s3 + $0x28] sm:$0xff] (!%p1243_p10), %v1604_v32 }
  0x32   : > { %346 = vst [vmem:[%s2074_s3 + $0x30] sm:$0xff] (!%p1243_p10), %v1604_v32  ;;  %347 = vst [vmem:[%s2074_s3 + $0x38] sm:$0xff] (!%p1243_p10), %v1604_v32 }
  0x33   : > { %348 = vst [vmem:[%s2074_s3 + $0x40] sm:$0xff] (!%p1243_p10), %v1604_v32  ;;  %349 = vst [vmem:[%s2074_s3 + $0x48] sm:$0xff] (!%p1243_p10), %v1604_v32 }
  0x34   : > { %350 = vst [vmem:[%s2074_s3 + $0x50] sm:$0xff] %v1604_v32  ;;  %351 = vst [vmem:[%s2074_s3 + $0x58] sm:$0xff] %v1604_v32 }
  0x35   : > { %352 = vst [vmem:[%s2074_s3 + $0x60] sm:$0xff] %v1604_v32  ;;  %353 = vst [vmem:[%s2074_s3 + $0x68] sm:$0xff] %v1604_v32 }
  0x36   : > { %354 = vst [vmem:[%s2074_s3 + $0x70] sm:$0xff] %v1604_v32  ;;  %355 = vst [vmem:[%s2074_s3 + $0x78] sm:$0xff] %v1604_v32 }
  0x37 PF: > { %v1484_v33 = vld [vmem:[%s1743_s7 + $0x40] sm:$0xff]   ;;  %v1488_v37 = vld [vmem:[%s1743_s7 + $0x48] sm:$0xff]   ;;  %v1492_v41 = vld [vmem:[%s1743_s7 + $0x50] sm:$0xff]   ;;  %p1308_p11 = scmp.ne.s32.totalorder %s1594_s14, 6 }
  0x38   : > { %v1485_v34 = vld [vmem:[%s1743_s7 + $0xc0] sm:$0xff]   ;;  %1315 = vmatprep.subr.bf16.mxu0 %v1484_v33  ;;  %v1489_v38 = vld [vmem:[%s1743_s7 + $0xc8] sm:$0xff]   ;;  %v1493_v42 = vld [vmem:[%s1743_s7 + $0xd0] sm:$0xff]  }
  0x39   : > { %v1486_v35 = vld [vmem:[%s1743_s7] sm:$0xff]   ;;  %1379 = vmatprep.subr.bf16.mxu1 %v1485_v34  ;;  %v1490_v39 = vld [vmem:[%s1743_s7 + $0x8] sm:$0xff]   ;;  %v1494_v43 = vld [vmem:[%s1743_s7 + $0x10] sm:$0xff]  }
  0x3a   : > { %v1487_v36 = vld [vmem:[%s1743_s7 + $0x80] sm:$0xff]   ;;  %1316 = vmatpush3.bf16.msra.mxu0 %v1486_v35  ;;  %v1491_v40 = vld [vmem:[%s1743_s7 + $0x88] sm:$0xff]   ;;  %v1495_v44 = vld [vmem:[%s1743_s7 + $0x90] sm:$0xff]  }
  0x3b   : > { %1380 = vmatpush3.bf16.msra.mxu1 %v1487_v36  ;;  %1317 = vmatprep.subr.bf16.mxu0 %v1488_v37  ;;  %v1496_v45 = vld [vmem:[%s1743_s7 + $0x58] sm:$0xff]   ;;  %v1500_v49 = vld [vmem:[%s1743_s7 + $0x60] sm:$0xff]   ;;  %v1504_v53 = vld [vmem:[%s1743_s7 + $0x68] sm:$0xff]  }
  0x3c   : > { %1381 = vmatprep.subr.bf16.mxu1 %v1489_v38  ;;  %v1497_v46 = vld [vmem:[%s1743_s7 + $0xd8] sm:$0xff]   ;;  %v1501_v50 = vld [vmem:[%s1743_s7 + $0xe0] sm:$0xff]   ;;  %v1505_v54 = vld [vmem:[%s1743_s7 + $0xe8] sm:$0xff]  }
  0x3d   : > { %v1498_v47 = vld [vmem:[%s1743_s7 + $0x18] sm:$0xff]   ;;  %v1502_v51 = vld [vmem:[%s1743_s7 + $0x20] sm:$0xff]   ;;  %v1506_v55 = vld [vmem:[%s1743_s7 + $0x28] sm:$0xff]  }
  0x3e   : > { %1318 = vmatpush3.bf16.msra.mxu0 %v1490_v39  ;;  %v1499_v48 = vld [vmem:[%s1743_s7 + $0x98] sm:$0xff]   ;;  %v1503_v52 = vld [vmem:[%s1743_s7 + $0xa0] sm:$0xff]   ;;  %v1507_v56 = vld [vmem:[%s1743_s7 + $0xa8] sm:$0xff]  }
  0x3f   : > { %1382 = vmatpush3.bf16.msra.mxu1 %v1491_v40  ;;  %1319 = vmatprep.subr.bf16.mxu0 %v1492_v41  ;;  %v1508_v57 = vld [vmem:[%s1743_s7 + $0x70] sm:$0xff]   ;;  %v1512_v61 = vld [vmem:[%s1743_s7 + $0x78] sm:$0xff]  }
  0x40   : > { %1383 = vmatprep.subr.bf16.mxu1 %v1493_v42  ;;  %v1509_v58 = vld [vmem:[%s1743_s7 + $0xf0] sm:$0xff]   ;;  %v1513_v62 = vld [vmem:[%s1743_s7 + $0xf8] sm:$0xff]   ;;  %v356_v42 = vld [vmem:[%s2074_s3] sm:$0xff] }
  0x41   : > { %v1510_v59 = vld [vmem:[%s1743_s7 + $0x30] sm:$0xff]   ;;  %v1514_v63 = vld [vmem:[%s1743_s7 + $0x38] sm:$0xff]  }
  0x42   : > { %1320 = vmatpush3.bf16.msra.mxu0 %v1494_v43  ;;  %v1511_v60 = vld [vmem:[%s1743_s7 + $0xb0] sm:$0xff]   ;;  %v1515_v0 = vld [vmem:[%s1743_s7 + $0xb8] sm:$0xff]  }
  0x43   : > { %1384 = vmatpush3.bf16.msra.mxu1 %v1495_v44  ;;  %1321 = vmatprep.subr.bf16.mxu0 %v1496_v45  ;;  %v1516_v1 = vld [vmem:[%s1745_s8] ss:$16 sps:$4 sm:$0xff]   ;;  %v1518_v2 = vld [vmem:[%s1745_s8 + $0x4] ss:$16 sps:$4 sm:$0xff]   ;;  %v1519_v3 = vld [vmem:[%s1745_s8 + $0x8] ss:$16 sps:$4 sm:$0xff]  }
  0x44   : > { %1385 = vmatprep.subr.bf16.mxu1 %v1497_v46  ;;  %v1521_v4 = vld [vmem:[%s1745_s8 + $0xc] ss:$16 sps:$4 sm:$0xff]   ;;  %852 = vmatprep.mubr.bf16.mxu0 %v1518_v2  ;;  %v1522_v5 = vld [vmem:[%s1745_s8 + $0x24] ss:$16 sps:$4 sm:$0xff]   ;;  %v1526_v7 = vld [vmem:[%s1745_s8 + $0x20] ss:$16 sps:$4 sm:$0xff]  }
  0x45   : > { %949 = vmatprep.mubr.bf16.mxu1 %v1521_v4  ;;  %v1524_v6 = vld [vmem:[%s1745_s8 + $0x2c] ss:$16 sps:$4 sm:$0xff]   ;;  %v1527_v8 = vld [vmem:[%s1745_s8 + $0x28] ss:$16 sps:$4 sm:$0xff]   ;;  %v1528_v9 = vld [vmem:[%s1745_s8 + $0x44] ss:$16 sps:$4 sm:$0xff]  }
  0x46   : > { %1322 = vmatpush3.bf16.msra.mxu0 %v1498_v47  ;;  %v1530_v10 = vld [vmem:[%s1745_s8 + $0x4c] ss:$16 sps:$4 sm:$0xff]   ;;  %v1532_v11 = vld [vmem:[%s1745_s8 + $0x40] ss:$16 sps:$4 sm:$0xff]   ;;  %v1533_v12 = vld [vmem:[%s1745_s8 + $0x48] ss:$16 sps:$4 sm:$0xff]  }
  0x47   : > { %1386 = vmatpush3.bf16.msra.mxu1 %v1499_v48  ;;  %1323 = vmatprep.subr.bf16.mxu0 %v1500_v49  ;;  %v1534_v13 = vld [vmem:[%s1745_s8 + $0x64] ss:$16 sps:$4 sm:$0xff]   ;;  %v1536_v14 = vld [vmem:[%s1745_s8 + $0x6c] ss:$16 sps:$4 sm:$0xff]   ;;  %v1538_v15 = vld [vmem:[%s1745_s8 + $0x60] ss:$16 sps:$4 sm:$0xff]  }
  0x48   : > { %1387 = vmatprep.subr.bf16.mxu1 %v1501_v50  ;;  %v1539_v16 = vld [vmem:[%s1745_s8 + $0x68] ss:$16 sps:$4 sm:$0xff]   ;;  %v1540_v17 = vld [vmem:[%s1745_s8 + $0x84] ss:$16 sps:$4 sm:$0xff]   ;;  %v1542_v18 = vld [vmem:[%s1745_s8 + $0x8c] ss:$16 sps:$4 sm:$0xff]  }
  0x49   : > { %v1544_v19 = vld [vmem:[%s1745_s8 + $0x80] ss:$16 sps:$4 sm:$0xff]   ;;  %v1545_v20 = vld [vmem:[%s1745_s8 + $0x88] ss:$16 sps:$4 sm:$0xff]   ;;  %v1546_v21 = vld [vmem:[%s1745_s8 + $0xa4] ss:$16 sps:$4 sm:$0xff]  }
  0x4a   : > { %1324 = vmatpush3.bf16.msra.mxu0 %v1502_v51  ;;  %v1548_v22 = vld [vmem:[%s1745_s8 + $0xac] ss:$16 sps:$4 sm:$0xff]   ;;  %v1550_v23 = vld [vmem:[%s1745_s8 + $0xa0] ss:$16 sps:$4 sm:$0xff]   ;;  %v1551_v24 = vld [vmem:[%s1745_s8 + $0xa8] ss:$16 sps:$4 sm:$0xff]  }
  0x4b   : > { %1388 = vmatpush3.bf16.msra.mxu1 %v1503_v52  ;;  %1325 = vmatprep.subr.bf16.mxu0 %v1504_v53  ;;  %v1552_v25 = vld [vmem:[%s1745_s8 + $0xc4] ss:$16 sps:$4 sm:$0xff]   ;;  %v1554_v26 = vld [vmem:[%s1745_s8 + $0xcc] ss:$16 sps:$4 sm:$0xff]   ;;  %v1556_v27 = vld [vmem:[%s1745_s8 + $0xc0] ss:$16 sps:$4 sm:$0xff]  }
  0x4c   : > { %1389 = vmatprep.subr.bf16.mxu1 %v1505_v54  ;;  %v1557_v28 = vld [vmem:[%s1745_s8 + $0xc8] ss:$16 sps:$4 sm:$0xff]   ;;  %v1558_v29 = vld [vmem:[%s1745_s8 + $0xe4] ss:$16 sps:$4 sm:$0xff]   ;;  %v1560_v30 = vld [vmem:[%s1745_s8 + $0xec] ss:$16 sps:$4 sm:$0xff]  }
  0x4d   : > { %v1562_v31 = vld [vmem:[%s1745_s8 + $0xe0] ss:$16 sps:$4 sm:$0xff]   ;;  %v1563_v32 = vld [vmem:[%s1745_s8 + $0xe8] ss:$16 sps:$4 sm:$0xff]  }
  0x4e   : > { %1326 = vmatpush3.bf16.msra.mxu0 %v1506_v55  ;;  %v357_v47 = vld [vmem:[%s2074_s3 + $0x8] sm:$0xff] }
  0x4f   : > { %1390 = vmatpush3.bf16.msra.mxu1 %v1507_v56  ;;  %1327 = vmatprep.subr.bf16.mxu0 %v1508_v57 }
  0x50   : > { %1391 = vmatprep.subr.bf16.mxu1 %v1509_v58 }
  0x52   : > { %1328 = vmatpush3.bf16.msra.mxu0 %v1510_v59 }
  0x53   : > { %1392 = vmatpush3.bf16.msra.mxu1 %v1511_v60  ;;  %1329 = vmatprep.subr.bf16.mxu0 %v1512_v61  ;;  %v358_v60 = vld [vmem:[%s2074_s3 + $0x10] sm:$0xff] }
  0x54   : > { %1393 = vmatprep.subr.bf16.mxu1 %v1513_v62 }
  0x56   : > { %1330 = vmatpush3.bf16.msra.mxu0 %v1514_v63 }
  0x57   : > { %1394 = vmatpush3.bf16.msra.mxu1 %v1515_v0 }
  0x59   : > { %853 = vmatmul.mubr.bf16.vlgmr.msra.gmra.mrb[0].mxu0 %v1516_v1  ;;  %v359_v1 = vld [vmem:[%s2074_s3 + $0x18] sm:$0xff] }
  0x5a   : > { %950 = vmatmul.mubr.bf16.vlgmr.msra.gmra.mrb[0].mxu1 %v1519_v3  ;;  %860 = vmatprep.mubr.bf16.mxu0 %v1522_v5 }
  0x5b   : > { %957 = vmatprep.mubr.bf16.mxu1 %v1524_v6 }
  0x61   : > { %861 = vmatmul.mubr.bf16.gmra.mrb[4].mxu0 %v1526_v7 }
  0x62   : > { %958 = vmatmul.mubr.bf16.gmra.mrb[4].mxu1 %v1527_v8  ;;  %868 = vmatprep.mubr.bf16.mxu0 %v1528_v9 }
  0x63   : > { %965 = vmatprep.mubr.bf16.mxu1 %v1530_v10 }
  0x69   : > { %869 = vmatmul.mubr.bf16.gmra.mrb[8].mxu0 %v1532_v11 }
  0x6a   : > { %966 = vmatmul.mubr.bf16.gmra.mrb[8].mxu1 %v1533_v12  ;;  %876 = vmatprep.mubr.bf16.mxu0 %v1534_v13 }
  0x6b   : > { %973 = vmatprep.mubr.bf16.mxu1 %v1536_v14  ;;  %v360_v14 = vld [vmem:[%s2074_s3 + $0x20] sm:$0xff] }
  0x71   : > { %877 = vmatmul.mubr.bf16.gmra.mrb[12].mxu0 %v1538_v15 }
  0x72   : > { %974 = vmatmul.mubr.bf16.gmra.mrb[12].mxu1 %v1539_v16  ;;  %884 = vmatprep.mubr.bf16.mxu0 %v1540_v17 }
  0x73   : > { %981 = vmatprep.mubr.bf16.mxu1 %v1542_v18 }
  0x79   : > { %885 = vmatmul.mubr.bf16.gmra.mrb[16].mxu0 %v1544_v19  ;;  %v361_v19 = vld [vmem:[%s2074_s3 + $0x28] sm:$0xff] }
  0x7a   : > { %982 = vmatmul.mubr.bf16.gmra.mrb[16].mxu1 %v1545_v20  ;;  %892 = vmatprep.mubr.bf16.mxu0 %v1546_v21 }
  0x7b   : > { %989 = vmatprep.mubr.bf16.mxu1 %v1548_v22 }
  0x81   : > { %893 = vmatmul.mubr.bf16.gmra.mrb[20].mxu0 %v1550_v23 }
  0x82   : > { %990 = vmatmul.mubr.bf16.gmra.mrb[20].mxu1 %v1551_v24  ;;  %900 = vmatprep.mubr.bf16.mxu0 %v1552_v25 }
  0x83   : > { %997 = vmatprep.mubr.bf16.mxu1 %v1554_v26 }
  0x89   : > { %901 = vmatmul.mubr.bf16.gmra.mrb[24].mxu0 %v1556_v27 }
  0x8a   : > { %998 = vmatmul.mubr.bf16.gmra.mrb[24].mxu1 %v1557_v28  ;;  %908 = vmatprep.mubr.bf16.mxu0 %v1558_v29 }
  0x8b   : > { %1005 = vmatprep.mubr.bf16.mxu1 %v1560_v30 }
  0x91   : > { %909 = vmatmul.mubr.bf16.gmra.mrb[28].mxu0 %v1562_v31 }
  0x92   : > { %1006 = vmatmul.mubr.bf16.gmra.mrb[28].mxu1 %v1563_v32  ;;  %v362_v32 = vld [vmem:[%s2074_s3 + $0x30] sm:$0xff] }
 0x12c   : > { %v1331_v33 = vpop.f32.mrb[0].mxu0 }
 0x12d   : > { %v1395_v34 = vpop.f32.mrb[0].mxu1  ;;  %v1332_v35 = vpop.f32.mrb[1].mxu0 }
 0x12e   : > { %v1333_v36 = vadd.f32 %v1332_v35, %v1331_v33  ;;  %v1396_v37 = vpop.f32.mrb[1].mxu1  ;;  %v1334_v38 = vpop.f32.mrb[2].mxu0 }
 0x12f   : > { %v1397_v39 = vadd.f32 %v1396_v37, %v1395_v34  ;;  %v1398_v40 = vpop.f32.mrb[2].mxu1  ;;  %v1335_v41 = vpop.f32.mrb[3].mxu0  ;;  %v363_v37 = vld [vmem:[%s2074_s3 + $0x38] sm:$0xff] }
 0x130   : > { %v1336_v43 = vadd.f32 %v1335_v41, %v1334_v38  ;;  %v1399_v44 = vpop.f32.mrb[3].mxu1 }
 0x131   : > { %v952_v45 = vadd.f32 %v1397_v39, %v1333_v36  ;;  %v1400_v46 = vadd.f32 %v1399_v44, %v1398_v40 }
 0x133   : > { %v1014_v48 = vadd.f32 %v952_v45, %v356_v42  ;;  %v955_v49 = vadd.f32 %v1400_v46, %v1336_v43 }
 0x134   : > { %v1337_v50 = vpop.f32.mrb[4].mxu0 }
 0x135   : > { %1030 = vst [vmem:[%s2074_s3] sm:$0xff] %v1014_v48  ;;  %v1015_v51 = vadd.f32 %v955_v49, %v357_v47  ;;  %v1401_v52 = vpop.f32.mrb[4].mxu1  ;;  %v1338_v53 = vpop.f32.mrb[5].mxu0 }
 0x136   : > { %v1339_v54 = vadd.f32 %v1338_v53, %v1337_v50  ;;  %v1402_v55 = vpop.f32.mrb[5].mxu1  ;;  %v1340_v56 = vpop.f32.mrb[6].mxu0  ;;  %v364_v50 = vld [vmem:[%s2074_s3 + $0x40] sm:$0xff] }
 0x137   : > { %1031 = vst [vmem:[%s2074_s3 + $0x8] sm:$0xff] %v1015_v51  ;;  %v1403_v57 = vadd.f32 %v1402_v55, %v1401_v52  ;;  %v1404_v58 = vpop.f32.mrb[6].mxu1  ;;  %v1341_v59 = vpop.f32.mrb[7].mxu0  ;;  %v365_v55 = vld [vmem:[%s2074_s3 + $0x48] sm:$0xff] }
 0x138   : > { %v1342_v61 = vadd.f32 %v1341_v59, %v1340_v56  ;;  %v1405_v62 = vpop.f32.mrb[7].mxu1 }
 0x139   : > { %v960_v63 = vadd.f32 %v1403_v57, %v1339_v54  ;;  %v1406_v0 = vadd.f32 %v1405_v62, %v1404_v58 }
 0x13b   : > { %v1016_v2 = vadd.f32 %v960_v63, %v358_v60  ;;  %v963_v3 = vadd.f32 %v1406_v0, %v1342_v61 }
 0x13c   : > { %v1343_v4 = vpop.f32.mrb[8].mxu0 }
 0x13d   : > { %1032 = vst [vmem:[%s2074_s3 + $0x10] sm:$0xff] %v1016_v2  ;;  %v1017_v5 = vadd.f32 %v963_v3, %v359_v1  ;;  %v1407_v6 = vpop.f32.mrb[8].mxu1  ;;  %v1344_v7 = vpop.f32.mrb[9].mxu0 }
 0x13e   : > { %v1345_v8 = vadd.f32 %v1344_v7, %v1343_v4  ;;  %v1408_v9 = vpop.f32.mrb[9].mxu1  ;;  %v1346_v10 = vpop.f32.mrb[10].mxu0  ;;  %v366_v4 = vld [vmem:[%s2074_s3 + $0x50] sm:$0xff] }
 0x13f   : > { %1033 = vst [vmem:[%s2074_s3 + $0x18] sm:$0xff] %v1017_v5  ;;  %v1409_v11 = vadd.f32 %v1408_v9, %v1407_v6  ;;  %v1410_v12 = vpop.f32.mrb[10].mxu1  ;;  %v1347_v13 = vpop.f32.mrb[11].mxu0  ;;  %v367_v9 = vld [vmem:[%s2074_s3 + $0x58] sm:$0xff] }
 0x140   : > { %v1348_v15 = vadd.f32 %v1347_v13, %v1346_v10  ;;  %v1411_v16 = vpop.f32.mrb[11].mxu1 }
 0x141   : > { %v968_v17 = vadd.f32 %v1409_v11, %v1345_v8  ;;  %v1412_v18 = vadd.f32 %v1411_v16, %v1410_v12 }
 0x143   : > { %v1018_v20 = vadd.f32 %v968_v17, %v360_v14  ;;  %v971_v21 = vadd.f32 %v1412_v18, %v1348_v15 }
 0x144   : > { %v1349_v22 = vpop.f32.mrb[12].mxu0 }
 0x145   : > { %1034 = vst [vmem:[%s2074_s3 + $0x20] sm:$0xff] %v1018_v20  ;;  %v1019_v23 = vadd.f32 %v971_v21, %v361_v19  ;;  %v1413_v24 = vpop.f32.mrb[12].mxu1  ;;  %v1350_v25 = vpop.f32.mrb[13].mxu0 }
 0x146   : > { %v1351_v26 = vadd.f32 %v1350_v25, %v1349_v22  ;;  %v1414_v27 = vpop.f32.mrb[13].mxu1  ;;  %v1352_v28 = vpop.f32.mrb[14].mxu0  ;;  %v368_v22 = vld [vmem:[%s2074_s3 + $0x60] sm:$0xff] }
 0x147   : > { %1035 = vst [vmem:[%s2074_s3 + $0x28] sm:$0xff] %v1019_v23  ;;  %v1415_v29 = vadd.f32 %v1414_v27, %v1413_v24  ;;  %v1416_v30 = vpop.f32.mrb[14].mxu1  ;;  %v1353_v31 = vpop.f32.mrb[15].mxu0  ;;  %v369_v27 = vld [vmem:[%s2074_s3 + $0x68] sm:$0xff] }
 0x148   : > { %v1354_v33 = vadd.f32 %v1353_v31, %v1352_v28  ;;  %v1417_v34 = vpop.f32.mrb[15].mxu1 }
 0x149   : > { %v976_v35 = vadd.f32 %v1415_v29, %v1351_v26  ;;  %v1418_v36 = vadd.f32 %v1417_v34, %v1416_v30 }
 0x14b   : > { %v1020_v38 = vadd.f32 %v976_v35, %v362_v32  ;;  %v979_v39 = vadd.f32 %v1418_v36, %v1354_v33 }
 0x14c   : > { %v1355_v40 = vpop.f32.mrb[16].mxu0 }
 0x14d   : > { %1036 = vst [vmem:[%s2074_s3 + $0x30] sm:$0xff] %v1020_v38  ;;  %v1021_v41 = vadd.f32 %v979_v39, %v363_v37  ;;  %v1419_v42 = vpop.f32.mrb[16].mxu1  ;;  %v1356_v43 = vpop.f32.mrb[17].mxu0 }
 0x14e   : > { %v1357_v44 = vadd.f32 %v1356_v43, %v1355_v40  ;;  %v1420_v45 = vpop.f32.mrb[17].mxu1  ;;  %v1358_v46 = vpop.f32.mrb[18].mxu0  ;;  %v370_v40 = vld [vmem:[%s2074_s3 + $0x70] sm:$0xff] }
 0x14f   : > { %1037 = vst [vmem:[%s2074_s3 + $0x38] sm:$0xff] %v1021_v41  ;;  %v1421_v47 = vadd.f32 %v1420_v45, %v1419_v42  ;;  %v1422_v48 = vpop.f32.mrb[18].mxu1  ;;  %v1359_v49 = vpop.f32.mrb[19].mxu0  ;;  %v371_v45 = vld [vmem:[%s2074_s3 + $0x78] sm:$0xff] }
 0x150   : > { %v1360_v51 = vadd.f32 %v1359_v49, %v1358_v46  ;;  %v1423_v52 = vpop.f32.mrb[19].mxu1  ;;  %v1050_v49 = vld [vmem:[%s2074_s3] sm:$0xff] (!%p1308_p11) }
 0x151   : > { %v984_v53 = vadd.f32 %v1421_v47, %v1357_v44  ;;  %v1424_v54 = vadd.f32 %v1423_v52, %v1422_v48 }
 0x153   : > { %v1022_v56 = vadd.f32 %v984_v53, %v364_v50  ;;  %v987_v57 = vadd.f32 %v1424_v54, %v1360_v51  ;;  %v1309_v50 = vld [vmem:[%s2073_s2] ss:$0 sm:$0xff] (!%p1308_p11)  ;;  %v1051_v51 = vld [vmem:[%s2074_s3 + $0x8] sm:$0xff] (!%p1308_p11)  ;;  %v1052_v54 = vld [vmem:[%s2074_s3 + $0x10] sm:$0xff] (!%p1308_p11) }
 0x154   : > { %v1361_v58 = vpop.f32.mrb[20].mxu0  ;;  %v1073_v52 = vadd.f32 (!%p1308_p11), %v1309_v50, %v1050_v49  ;;  %v1074_v53 = vadd.f32 (!%p1308_p11), %v1309_v50, %v1051_v51 }
 0x155   : > { %1038 = vst [vmem:[%s2074_s3 + $0x40] sm:$0xff] %v1022_v56  ;;  %v1023_v59 = vadd.f32 %v987_v57, %v365_v55  ;;  %v1425_v60 = vpop.f32.mrb[20].mxu1  ;;  %v1362_v61 = vpop.f32.mrb[21].mxu0  ;;  %v1053_v55 = vld [vmem:[%s2074_s3 + $0x18] sm:$0xff] (!%p1308_p11)  ;;  %v1054_v56 = vld [vmem:[%s2074_s3 + $0x20] sm:$0xff] (!%p1308_p11)  ;;  %v1075_v57 = vadd.f32 (!%p1308_p11), %v1309_v50, %v1052_v54 }
 0x156   : > { %v1363_v62 = vadd.f32 %v1362_v61, %v1361_v58  ;;  %v1426_v63 = vpop.f32.mrb[21].mxu1  ;;  %v1364_v0 = vpop.f32.mrb[22].mxu0  ;;  %v1076_v58 = vadd.f32 (!%p1308_p11), %v1309_v50, %v1053_v55  ;;  %v1056_v61 = vld [vmem:[%s2074_s3 + $0x30] sm:$0xff] (!%p1308_p11) }
 0x157   : > { %1039 = vst [vmem:[%s2074_s3 + $0x48] sm:$0xff] %v1023_v59  ;;  %v1427_v1 = vadd.f32 %v1426_v63, %v1425_v60  ;;  %v1428_v2 = vpop.f32.mrb[22].mxu1  ;;  %v1365_v3 = vpop.f32.mrb[23].mxu0  ;;  %v1077_v59 = vadd.f32 (!%p1308_p11), %v1309_v50, %v1054_v56  ;;  %v1055_v60 = vld [vmem:[%s2074_s3 + $0x28] sm:$0xff] (!%p1308_p11)  ;;  %v1089_v63 = vmax.f32 (!%p1308_p11), %v1073_v52, 0.0 }
 0x158   : > { %v1366_v5 = vadd.f32 %v1365_v3, %v1364_v0  ;;  %v1429_v6 = vpop.f32.mrb[23].mxu1  ;;  %v1090_v0 = vmax.f32 (!%p1308_p11), %v1074_v53, 0.0 }
 0x159   : > { %v992_v7 = vadd.f32 %v1427_v1, %v1363_v62  ;;  %v1430_v8 = vadd.f32 %v1429_v6, %v1428_v2  ;;  %v1057_v62 = vld [vmem:[%s2074_s3 + $0x38] sm:$0xff] (!%p1308_p11)  ;;  %v1078_v1 = vadd.f32 (!%p1308_p11), %v1309_v50, %v1055_v60  ;;  %v1079_v2 = vadd.f32 (!%p1308_p11), %v1309_v50, %v1056_v61  ;;  %1105 = vst [vmem:[%s2074_s3] sm:$0xff] (!%p1308_p11), %v1089_v63 }
 0x15a   : > { %v1091_v6 = vmax.f32 (!%p1308_p11), %v1075_v57, 0.0  ;;  %1106 = vst [vmem:[%s2074_s3 + $0x8] sm:$0xff] (!%p1308_p11), %v1090_v0 }
 0x15b   : > { %v1024_v10 = vadd.f32 %v992_v7, %v366_v4  ;;  %v995_v11 = vadd.f32 %v1430_v8, %v1366_v5  ;;  %v1092_v7 = vmax.f32 (!%p1308_p11), %v1076_v58, 0.0  ;;  %v1093_v8 = vmax.f32 (!%p1308_p11), %v1077_v59, 0.0 }
 0x15c   : > { %v1367_v12 = vpop.f32.mrb[24].mxu0  ;;  %v1058_v3 = vld [vmem:[%s2074_s3 + $0x40] sm:$0xff] (!%p1308_p11)  ;;  %1107 = vst [vmem:[%s2074_s3 + $0x10] sm:$0xff] (!%p1308_p11), %v1091_v6 }
 0x15d   : > { %1040 = vst [vmem:[%s2074_s3 + $0x50] sm:$0xff] %v1024_v10  ;;  %v1025_v13 = vadd.f32 %v995_v11, %v367_v9  ;;  %v1431_v14 = vpop.f32.mrb[24].mxu1  ;;  %v1368_v15 = vpop.f32.mrb[25].mxu0  ;;  %v1080_v9 = vadd.f32 (!%p1308_p11), %v1309_v50, %v1057_v62  ;;  %1108 = vst [vmem:[%s2074_s3 + $0x18] sm:$0xff] (!%p1308_p11), %v1092_v7 }
 0x15e   : > { %v1369_v16 = vadd.f32 %v1368_v15, %v1367_v12  ;;  %v1432_v17 = vpop.f32.mrb[25].mxu1  ;;  %v1370_v18 = vpop.f32.mrb[26].mxu0  ;;  %v1059_v4 = vld [vmem:[%s2074_s3 + $0x48] sm:$0xff] (!%p1308_p11)  ;;  %v1081_v15 = vadd.f32 (!%p1308_p11), %v1309_v50, %v1058_v3  ;;  %1109 = vst [vmem:[%s2074_s3 + $0x20] sm:$0xff] (!%p1308_p11), %v1093_v8 }
 0x15f   : > { %1041 = vst [vmem:[%s2074_s3 + $0x58] sm:$0xff] %v1025_v13  ;;  %v1433_v19 = vadd.f32 %v1432_v17, %v1431_v14  ;;  %v1434_v20 = vpop.f32.mrb[26].mxu1  ;;  %v1371_v21 = vpop.f32.mrb[27].mxu0  ;;  %v1094_v13 = vmax.f32 (!%p1308_p11), %v1078_v1, 0.0  ;;  %v1095_v14 = vmax.f32 (!%p1308_p11), %v1079_v2, 0.0 }
 0x160   : > { %v1372_v23 = vadd.f32 %v1371_v21, %v1370_v18  ;;  %v1435_v24 = vpop.f32.mrb[27].mxu1 }
 0x161   : > { %v1000_v25 = vadd.f32 %v1433_v19, %v1369_v16  ;;  %v1436_v26 = vadd.f32 %v1435_v24, %v1434_v20  ;;  %v1082_v16 = vadd.f32 (!%p1308_p11), %v1309_v50, %v1059_v4  ;;  %v1096_v19 = vmax.f32 (!%p1308_p11), %v1080_v9, 0.0  ;;  %1110 = vst [vmem:[%s2074_s3 + $0x28] sm:$0xff] (!%p1308_p11), %v1094_v13  ;;  %1111 = vst [vmem:[%s2074_s3 + $0x30] sm:$0xff] (!%p1308_p11), %v1095_v14 }
 0x163   : > { %v1026_v28 = vadd.f32 %v1000_v25, %v368_v22  ;;  %v1003_v29 = vadd.f32 %v1436_v26, %v1372_v23  ;;  %v1097_v23 = vmax.f32 (!%p1308_p11), %v1081_v15, 0.0  ;;  %v1098_v24 = vmax.f32 (!%p1308_p11), %v1082_v16, 0.0  ;;  %1112 = vst [vmem:[%s2074_s3 + $0x38] sm:$0xff] (!%p1308_p11), %v1096_v19 }
 0x164   : > { %v1373_v30 = vpop.f32.mrb[28].mxu0  ;;  %v1060_v5 = vld [vmem:[%s2074_s3 + $0x50] sm:$0xff] (!%p1308_p11) }
 0x165   : > { %1042 = vst [vmem:[%s2074_s3 + $0x60] sm:$0xff] %v1026_v28  ;;  %v1027_v31 = vadd.f32 %v1003_v29, %v369_v27  ;;  %v1437_v32 = vpop.f32.mrb[28].mxu1  ;;  %v1374_v33 = vpop.f32.mrb[29].mxu0  ;;  %v1083_v20 = vadd.f32 (!%p1308_p11), %v1309_v50, %v1060_v5  ;;  %1113 = vst [vmem:[%s2074_s3 + $0x40] sm:$0xff] (!%p1308_p11), %v1097_v23 }
 0x166   : > { %v1375_v34 = vadd.f32 %v1374_v33, %v1373_v30  ;;  %v1438_v35 = vpop.f32.mrb[29].mxu1  ;;  %v1376_v36 = vpop.f32.mrb[30].mxu0  ;;  %v1061_v10 = vld [vmem:[%s2074_s3 + $0x58] sm:$0xff] (!%p1308_p11)  ;;  %1114 = vst [vmem:[%s2074_s3 + $0x48] sm:$0xff] (!%p1308_p11), %v1098_v24 }
 0x167   : > { %1043 = vst [vmem:[%s2074_s3 + $0x68] sm:$0xff] %v1027_v31  ;;  %v1439_v37 = vadd.f32 %v1438_v35, %v1437_v32  ;;  %v1440_v38 = vpop.f32.mrb[30].mxu1  ;;  %v1377_v39 = vpop.f32.mrb[31].mxu0  ;;  %v1084_v21 = vadd.f32 (!%p1308_p11), %v1309_v50, %v1061_v10  ;;  %v1099_v27 = vmax.f32 (!%p1308_p11), %v1083_v20, 0.0 }
 0x168   : > { %v1378_v41 = vadd.f32 %v1377_v39, %v1376_v36  ;;  %v1441_v42 = vpop.f32.mrb[31].mxu1 }
 0x169   : > { %v1008_v43 = vadd.f32 %v1439_v37, %v1375_v34  ;;  %v1442_v44 = vadd.f32 %v1441_v42, %v1440_v38  ;;  %1049 = sbr.rel (%p1308_p11) target bundleno = 380 (0x17c), region = 63  ;;  %v1100_v28 = vmax.f32 (!%p1308_p11), %v1084_v21, 0.0  ;;  %1115 = vst [vmem:[%s2074_s3 + $0x50] sm:$0xff] (!%p1308_p11), %v1099_v27 }
 0x16b   : > { %v1028_v46 = vadd.f32 %v1008_v43, %v370_v40  ;;  %v1011_v47 = vadd.f32 %v1442_v44, %v1378_v41  ;;  %1116 = vst [vmem:[%s2074_s3 + $0x58] sm:$0xff] (!%p1308_p11), %v1100_v28 }
 0x16c   : > { %v1062_v11 = vld [vmem:[%s2074_s3 + $0x60] sm:$0xff] (!%p1308_p11) }
 0x16d   : > { %1044 = vst [vmem:[%s2074_s3 + $0x70] sm:$0xff] %v1028_v46  ;;  %v1029_v48 = vadd.f32 %v1011_v47, %v371_v45  ;;  %v1085_v22 = vadd.f32 (!%p1308_p11), %v1309_v50, %v1062_v11 }
 0x16e   : > { %v1063_v12 = vld [vmem:[%s2074_s3 + $0x68] sm:$0xff] (!%p1308_p11) }
 0x16f   : > { %1045 = vst [vmem:[%s2074_s3 + $0x78] sm:$0xff] %v1029_v48  ;;  %v1086_v25 = vadd.f32 (!%p1308_p11), %v1309_v50, %v1063_v12  ;;  %v1101_v29 = vmax.f32 (!%p1308_p11), %v1085_v22, 0.0 }
 0x171   : > { %v1102_v31 = vmax.f32 %v1086_v25, 0.0  ;;  %1117 = vst [vmem:[%s2074_s3 + $0x60] sm:$0xff] %v1101_v29 }
 0x173   : > { %1118 = vst [vmem:[%s2074_s3 + $0x68] sm:$0xff] %v1102_v31 }
 0x174   : > { %v1064_v17 = vld [vmem:[%s2074_s3 + $0x70] sm:$0xff] }
 0x175   : > { %v1087_v26 = vadd.f32 %v1309_v50, %v1064_v17 }
 0x176   : > { %v1065_v18 = vld [vmem:[%s2074_s3 + $0x78] sm:$0xff] }
 0x177   : > { %v1088_v30 = vadd.f32 %v1309_v50, %v1065_v18  ;;  %v1103_v32 = vmax.f32 %v1087_v26, 0.0 }
 0x179   : > { %v1104_v33 = vmax.f32 %v1088_v30, 0.0  ;;  %1119 = vst [vmem:[%s2074_s3 + $0x70] sm:$0xff] %v1103_v32 }
 0x17b   : > { %1120 = vst [vmem:[%s2074_s3 + $0x78] sm:$0xff] %v1104_v33 }
 0x17c PF: > { %s13_s16 = sadd.s32 1, %s1602_s16   ;;  %s2075_s12 = smov %s1590_s13 }
 0x17d   : > { %p10_p12 = scmp.ge.s32.totalorder %s13_s16, 9   ;;  %s2076_s13 = smov %s1660_s20 }
 0x17e   : > { %s2077_s14 = smov %s1598_s15  ;;  %s2078_s15 = smov %s2080_s17 }
 0x17f   :  { %12 = sbr.rel (!%p10_p12) target bundleno = 3 (0x3), region = 104 }

// kernel: acrlsd_forward.11
= control target key start
LH: loop header
LB: loop body
LE: loop exit
PB: predicated region body
PF: predicated region fallthrough
CT: control target
= control target key end

     0   :  { %s1757_s1 = inlined_call_operand.vmem [shape: bf16[640,128], index: 1, kind: input, shape index: {}]   ;;  %s1758_s0 = inlined_call_operand.vmem [shape: bf16[128,640], index: 0, kind: input, shape index: {}]   ;;  %s1759_s2 = inlined_call_operand.vmem [shape: f32[1,128], index: 2, kind: input, shape index: {}]   ;;  %s1760_s3 = inlined_call_operand.vmem [shape: f32[128,128], index: 3, kind: output, shape index: {}]  }
   0x1   :  { %v1302_v0 = vld [vmem:[%s1757_s1 + $0x40] sm:$0xff]   ;;  %v1306_v4 = vld [vmem:[%s1757_s1 + $0x48] sm:$0xff]   ;;  %v1310_v8 = vld [vmem:[%s1757_s1 + $0x50] sm:$0xff]  }
   0x2   :  { %v1303_v1 = vld [vmem:[%s1757_s1 + $0xc0] sm:$0xff]   ;;  %1109 = vmatprep.subr.bf16.mxu0 %v1302_v0  ;;  %v1307_v5 = vld [vmem:[%s1757_s1 + $0xc8] sm:$0xff]   ;;  %v1311_v9 = vld [vmem:[%s1757_s1 + $0xd0] sm:$0xff]  }
   0x3   :  { %v1304_v2 = vld [vmem:[%s1757_s1] sm:$0xff]   ;;  %1173 = vmatprep.subr.bf16.mxu1 %v1303_v1  ;;  %v1308_v6 = vld [vmem:[%s1757_s1 + $0x8] sm:$0xff]   ;;  %v1312_v10 = vld [vmem:[%s1757_s1 + $0x10] sm:$0xff]  }
   0x4   :  { %v1305_v3 = vld [vmem:[%s1757_s1 + $0x80] sm:$0xff]   ;;  %1110 = vmatpush3.bf16.msra.mxu0 %v1304_v2  ;;  %v1309_v7 = vld [vmem:[%s1757_s1 + $0x88] sm:$0xff]   ;;  %v1313_v11 = vld [vmem:[%s1757_s1 + $0x90] sm:$0xff]  }
   0x5   :  { %1174 = vmatpush3.bf16.msra.mxu1 %v1305_v3  ;;  %1111 = vmatprep.subr.bf16.mxu0 %v1306_v4  ;;  %v1314_v12 = vld [vmem:[%s1757_s1 + $0x58] sm:$0xff]   ;;  %v1318_v16 = vld [vmem:[%s1757_s1 + $0x60] sm:$0xff]   ;;  %v1322_v20 = vld [vmem:[%s1757_s1 + $0x68] sm:$0xff]  }
   0x6   :  { %1175 = vmatprep.subr.bf16.mxu1 %v1307_v5  ;;  %v1315_v13 = vld [vmem:[%s1757_s1 + $0xd8] sm:$0xff]   ;;  %v1319_v17 = vld [vmem:[%s1757_s1 + $0xe0] sm:$0xff]   ;;  %v1323_v21 = vld [vmem:[%s1757_s1 + $0xe8] sm:$0xff]  }
   0x7   :  { %v1316_v14 = vld [vmem:[%s1757_s1 + $0x18] sm:$0xff]   ;;  %v1320_v18 = vld [vmem:[%s1757_s1 + $0x20] sm:$0xff]   ;;  %v1324_v22 = vld [vmem:[%s1757_s1 + $0x28] sm:$0xff]  }
   0x8   :  { %1112 = vmatpush3.bf16.msra.mxu0 %v1308_v6  ;;  %v1317_v15 = vld [vmem:[%s1757_s1 + $0x98] sm:$0xff]   ;;  %v1321_v19 = vld [vmem:[%s1757_s1 + $0xa0] sm:$0xff]   ;;  %v1325_v23 = vld [vmem:[%s1757_s1 + $0xa8] sm:$0xff]  }
   0x9   :  { %1176 = vmatpush3.bf16.msra.mxu1 %v1309_v7  ;;  %1113 = vmatprep.subr.bf16.mxu0 %v1310_v8  ;;  %v1326_v24 = vld [vmem:[%s1757_s1 + $0x70] sm:$0xff]   ;;  %v1330_v28 = vld [vmem:[%s1757_s1 + $0x78] sm:$0xff]   ;;  %v1339_v35 = vld [vmem:[%s1758_s0 + $0xc] ss:$20 sps:$4 sm:$0xff]  }
   0xa   :  { %1177 = vmatprep.subr.bf16.mxu1 %v1311_v9  ;;  %v1327_v25 = vld [vmem:[%s1757_s1 + $0xf0] sm:$0xff]   ;;  %v1331_v29 = vld [vmem:[%s1757_s1 + $0xf8] sm:$0xff]   ;;  %v1340_v36 = vld [vmem:[%s1757_s1 + $0x100] sm:$0xff]   ;;  %756 = vmatprep.mubr.bf16.mxu1 %v1339_v35 }
   0xb   :  { %v1328_v26 = vld [vmem:[%s1757_s1 + $0x30] sm:$0xff]   ;;  %v1332_v30 = vld [vmem:[%s1757_s1 + $0x38] sm:$0xff]   ;;  %v1341_v37 = vld [vmem:[%s1758_s0 + $0x2c] ss:$20 sps:$4 sm:$0xff]  }
   0xc   :  { %1114 = vmatpush3.bf16.msra.mxu0 %v1312_v10  ;;  %v1329_v27 = vld [vmem:[%s1757_s1 + $0xb0] sm:$0xff]   ;;  %v1333_v31 = vld [vmem:[%s1757_s1 + $0xb8] sm:$0xff]   ;;  %v1347_v39 = vld [vmem:[%s1757_s1 + $0x108] sm:$0xff]  }
   0xd   :  { %1178 = vmatpush3.bf16.msra.mxu1 %v1313_v11  ;;  %1115 = vmatprep.subr.bf16.mxu0 %v1314_v12  ;;  %v1334_v32 = vld [vmem:[%s1758_s0] ss:$20 sps:$4 sm:$0xff]   ;;  %v1336_v33 = vld [vmem:[%s1758_s0 + $0x4] ss:$20 sps:$4 sm:$0xff]   ;;  %v1337_v34 = vld [vmem:[%s1758_s0 + $0x8] ss:$20 sps:$4 sm:$0xff]  }
   0xe   :  { %1179 = vmatprep.subr.bf16.mxu1 %v1315_v13  ;;  %659 = vmatprep.mubr.bf16.mxu0 %v1336_v33  ;;  %v1343_v38 = vld [vmem:[%s1758_s0 + $0x34] ss:$20 sps:$4 sm:$0xff]   ;;  %v1346_v41 = vld [vmem:[%s1758_s0 + $0x30] ss:$20 sps:$4 sm:$0xff]   ;;  %v1361_v45 = vld [vmem:[%s1757_s1 + $0x118] sm:$0xff]  }
   0xf   :  { %v1345_v40 = vld [vmem:[%s1758_s0 + $0x28] ss:$20 sps:$4 sm:$0xff]   ;;  %v1354_v44 = vld [vmem:[%s1757_s1 + $0x110] sm:$0xff]   ;;  %v1353_v47 = vld [vmem:[%s1758_s0 + $0x58] ss:$20 sps:$4 sm:$0xff]  }
  0x10   :  { %1116 = vmatpush3.bf16.msra.mxu0 %v1316_v14  ;;  %v1348_v42 = vld [vmem:[%s1758_s0 + $0x54] ss:$20 sps:$4 sm:$0xff]   ;;  %v1350_v43 = vld [vmem:[%s1758_s0 + $0x5c] ss:$20 sps:$4 sm:$0xff]   ;;  %v1357_v49 = vld [vmem:[%s1758_s0 + $0x84] ss:$20 sps:$4 sm:$0xff]  }
  0x11   :  { %1180 = vmatpush3.bf16.msra.mxu1 %v1317_v15  ;;  %1117 = vmatprep.subr.bf16.mxu0 %v1318_v16  ;;  %v1352_v46 = vld [vmem:[%s1758_s0 + $0x50] ss:$20 sps:$4 sm:$0xff]   ;;  %v1375_v51 = vld [vmem:[%s1757_s1 + $0x128] sm:$0xff]   ;;  %v1360_v53 = vld [vmem:[%s1758_s0 + $0x80] ss:$20 sps:$4 sm:$0xff]  }
  0x12   :  { %1181 = vmatprep.subr.bf16.mxu1 %v1319_v17  ;;  %v1355_v48 = vld [vmem:[%s1758_s0 + $0x7c] ss:$20 sps:$4 sm:$0xff]   ;;  %v1368_v50 = vld [vmem:[%s1757_s1 + $0x120] sm:$0xff]   ;;  %v1359_v52 = vld [vmem:[%s1758_s0 + $0x78] ss:$20 sps:$4 sm:$0xff]  }
  0x13   :  { %v1362_v54 = vld [vmem:[%s1758_s0 + $0xa4] ss:$20 sps:$4 sm:$0xff]   ;;  %v1382_v55 = vld [vmem:[%s1757_s1 + $0x130] sm:$0xff]   ;;  %v1364_v56 = vld [vmem:[%s1758_s0 + $0xac] ss:$20 sps:$4 sm:$0xff]  }
  0x14   :  { %1118 = vmatpush3.bf16.msra.mxu0 %v1320_v18  ;;  %v1389_v57 = vld [vmem:[%s1757_s1 + $0x138] sm:$0xff]   ;;  %v1366_v58 = vld [vmem:[%s1758_s0 + $0xa0] ss:$20 sps:$4 sm:$0xff]   ;;  %v1374_v63 = vld [vmem:[%s1758_s0 + $0xd0] ss:$20 sps:$4 sm:$0xff]  }
  0x15   :  { %1182 = vmatpush3.bf16.msra.mxu1 %v1321_v19  ;;  %1119 = vmatprep.subr.bf16.mxu0 %v1322_v20  ;;  %v1367_v59 = vld [vmem:[%s1758_s0 + $0xa8] ss:$20 sps:$4 sm:$0xff]   ;;  %v1369_v60 = vld [vmem:[%s1758_s0 + $0xcc] ss:$20 sps:$4 sm:$0xff]   ;;  %v1380_v2 = vld [vmem:[%s1758_s0 + $0xf0] ss:$20 sps:$4 sm:$0xff]  }
  0x16   :  { %1183 = vmatprep.subr.bf16.mxu1 %v1323_v21  ;;  %v1371_v61 = vld [vmem:[%s1758_s0 + $0xd4] ss:$20 sps:$4 sm:$0xff]   ;;  %v1378_v1 = vld [vmem:[%s1758_s0 + $0xfc] ss:$20 sps:$4 sm:$0xff]   ;;  %v1381_v3 = vld [vmem:[%s1758_s0 + $0xf8] ss:$20 sps:$4 sm:$0xff]  }
  0x17   :  { %v1373_v62 = vld [vmem:[%s1758_s0 + $0xc8] ss:$20 sps:$4 sm:$0xff]   ;;  %v1385_v5 = vld [vmem:[%s1758_s0 + $0x124] ss:$20 sps:$4 sm:$0xff]   ;;  %v1388_v7 = vld [vmem:[%s1758_s0 + $0x120] ss:$20 sps:$4 sm:$0xff]  }
  0x18   :  { %1120 = vmatpush3.bf16.msra.mxu0 %v1324_v22  ;;  %v1376_v0 = vld [vmem:[%s1758_s0 + $0xf4] ss:$20 sps:$4 sm:$0xff]   ;;  %v1383_v4 = vld [vmem:[%s1758_s0 + $0x11c] ss:$20 sps:$4 sm:$0xff]   ;;  %v1387_v6 = vld [vmem:[%s1758_s0 + $0x118] ss:$20 sps:$4 sm:$0xff]  }
  0x19   :  { %1184 = vmatpush3.bf16.msra.mxu1 %v1325_v23  ;;  %1121 = vmatprep.subr.bf16.mxu0 %v1326_v24  ;;  %v1390_v8 = vld [vmem:[%s1758_s0 + $0x10] ss:$20 sps:$4 sm:$0xff]   ;;  %v1392_v10 = vld [vmem:[%s1758_s0 + $0x38] ss:$20 sps:$4 sm:$0xff]   ;;  %v1394_v12 = vld [vmem:[%s1758_s0 + $0x60] ss:$20 sps:$4 sm:$0xff]  }
  0x1a   :  { %1185 = vmatprep.subr.bf16.mxu1 %v1327_v25  ;;  %v1391_v9 = vld [vmem:[%s1758_s0 + $0xb0] ss:$20 sps:$4 sm:$0xff]   ;;  %v1393_v11 = vld [vmem:[%s1758_s0 + $0xd8] ss:$20 sps:$4 sm:$0xff]   ;;  %v1395_v13 = vld [vmem:[%s1758_s0 + $0x100] ss:$20 sps:$4 sm:$0xff]  }
  0x1b   :  { %v1396_v14 = vld [vmem:[%s1758_s0 + $0x88] ss:$20 sps:$4 sm:$0xff]  }
  0x1c   :  { %1122 = vmatpush3.bf16.msra.mxu0 %v1328_v26  ;;  %v1397_v15 = vld [vmem:[%s1758_s0 + $0x128] ss:$20 sps:$4 sm:$0xff]  }
  0x1d   :  { %1186 = vmatpush3.bf16.msra.mxu1 %v1329_v27  ;;  %1123 = vmatprep.subr.bf16.mxu0 %v1330_v28 }
  0x1e   :  { %1187 = vmatprep.subr.bf16.mxu1 %v1331_v29 }
  0x20   :  { %1124 = vmatpush3.bf16.msra.mxu0 %v1332_v30 }
  0x21   :  { %1188 = vmatpush3.bf16.msra.mxu1 %v1333_v31  ;;  %1253 = vmatprep.subr.bf16.mxu0 %v1340_v36 }
  0x22   :  { %1285 = vmatprep.subr.bf16.mxu1 %v1340_v36 }
  0x23   :  { %660 = vmatmul.mubr.bf16.vlgmr.msra.gmra.mrb[0].mxu0 %v1334_v32 }
  0x24   :  { %757 = vmatmul.mubr.bf16.vlgmr.msra.gmra.mrb[0].mxu1 %v1337_v34  ;;  %1254 = vmatpush3.bf16.msra.mxu0 %v1340_v36 }
  0x25   :  { %1293 = vmatpush3.bf16.msra.mxu1 %v1340_v36  ;;  %667 = vmatprep.mubr.bf16.mxu0 %v1341_v37 }
  0x26   :  { %764 = vmatprep.mubr.bf16.mxu1 %v1343_v38  ;;  %1255 = vmatprep.subr.bf16.mxu0 %v1347_v39 }
  0x27   :  { %1286 = vmatprep.subr.bf16.mxu1 %v1347_v39 }
  0x28   :  { %1256 = vmatpush3.bf16.msra.mxu0 %v1347_v39 }
  0x29   :  { %1294 = vmatpush3.bf16.msra.mxu1 %v1347_v39  ;;  %1257 = vmatprep.subr.bf16.mxu0 %v1354_v44 }
  0x2a   :  { %1287 = vmatprep.subr.bf16.mxu1 %v1354_v44 }
  0x2b   :  { %668 = vmatmul.mubr.bf16.gmra.mrb[4].mxu0 %v1345_v40 }
  0x2c   :  { %765 = vmatmul.mubr.bf16.gmra.mrb[4].mxu1 %v1346_v41  ;;  %675 = vmatprep.mubr.bf16.mxu0 %v1348_v42 }
  0x2d   :  { %772 = vmatprep.mubr.bf16.mxu1 %v1350_v43  ;;  %1258 = vmatpush3.bf16.msra.mxu0 %v1354_v44 }
  0x2e   :  { %1295 = vmatpush3.bf16.msra.mxu1 %v1354_v44  ;;  %1259 = vmatprep.subr.bf16.mxu0 %v1361_v45 }
  0x2f   :  { %1288 = vmatprep.subr.bf16.mxu1 %v1361_v45 }
  0x31   :  { %1260 = vmatpush3.bf16.msra.mxu0 %v1361_v45 }
  0x32   :  { %1296 = vmatpush3.bf16.msra.mxu1 %v1361_v45  ;;  %1261 = vmatprep.subr.bf16.mxu0 %v1368_v50 }
  0x33   :  { %676 = vmatmul.mubr.bf16.gmra.mrb[8].mxu0 %v1352_v46  ;;  %1289 = vmatprep.subr.bf16.mxu1 %v1368_v50 }
  0x34   :  { %773 = vmatmul.mubr.bf16.gmra.mrb[8].mxu1 %v1353_v47  ;;  %683 = vmatprep.mubr.bf16.mxu0 %v1355_v48 }
  0x35   :  { %780 = vmatprep.mubr.bf16.mxu1 %v1357_v49  ;;  %1262 = vmatpush3.bf16.msra.mxu0 %v1368_v50 }
  0x36   :  { %1297 = vmatpush3.bf16.msra.mxu1 %v1368_v50  ;;  %1263 = vmatprep.subr.bf16.mxu0 %v1375_v51 }
  0x37   :  { %1290 = vmatprep.subr.bf16.mxu1 %v1375_v51 }
  0x39   :  { %1264 = vmatpush3.bf16.msra.mxu0 %v1375_v51 }
  0x3a   :  { %1298 = vmatpush3.bf16.msra.mxu1 %v1375_v51  ;;  %1265 = vmatprep.subr.bf16.mxu0 %v1382_v55 }
  0x3b   :  { %684 = vmatmul.mubr.bf16.gmra.mrb[12].mxu0 %v1359_v52  ;;  %1291 = vmatprep.subr.bf16.mxu1 %v1382_v55 }
  0x3c   :  { %781 = vmatmul.mubr.bf16.gmra.mrb[12].mxu1 %v1360_v53  ;;  %691 = vmatprep.mubr.bf16.mxu0 %v1362_v54 }
  0x3d   :  { %788 = vmatprep.mubr.bf16.mxu1 %v1364_v56  ;;  %1266 = vmatpush3.bf16.msra.mxu0 %v1382_v55 }
  0x3e   :  { %1299 = vmatpush3.bf16.msra.mxu1 %v1382_v55  ;;  %1267 = vmatprep.subr.bf16.mxu0 %v1389_v57 }
  0x3f   :  { %1292 = vmatprep.subr.bf16.mxu1 %v1389_v57 }
  0x41   :  { %1268 = vmatpush3.bf16.msra.mxu0 %v1389_v57 }
  0x42   :  { %1300 = vmatpush3.bf16.msra.mxu1 %v1389_v57 }
  0x43   :  { %692 = vmatmul.mubr.bf16.gmra.mrb[16].mxu0 %v1366_v58 }
  0x44   :  { %789 = vmatmul.mubr.bf16.gmra.mrb[16].mxu1 %v1367_v59  ;;  %699 = vmatprep.mubr.bf16.mxu0 %v1369_v60 }
  0x45   :  { %796 = vmatprep.mubr.bf16.mxu1 %v1371_v61 }
  0x4b   :  { %700 = vmatmul.mubr.bf16.gmra.mrb[20].mxu0 %v1373_v62 }
  0x4c   :  { %797 = vmatmul.mubr.bf16.gmra.mrb[20].mxu1 %v1374_v63  ;;  %707 = vmatprep.mubr.bf16.mxu0 %v1376_v0 }
  0x4d   :  { %804 = vmatprep.mubr.bf16.mxu1 %v1378_v1 }
  0x53   :  { %708 = vmatmul.mubr.bf16.gmra.mrb[24].mxu0 %v1380_v2 }
  0x54   :  { %805 = vmatmul.mubr.bf16.gmra.mrb[24].mxu1 %v1381_v3  ;;  %715 = vmatprep.mubr.bf16.mxu0 %v1383_v4 }
  0x55   :  { %812 = vmatprep.mubr.bf16.mxu1 %v1385_v5 }
  0x5b   :  { %716 = vmatmul.mubr.bf16.gmra.mrb[28].mxu0 %v1387_v6 }
  0x5c   :  { %813 = vmatmul.mubr.bf16.gmra.mrb[28].mxu1 %v1388_v7  ;;  %1269 = vmatprep.mubr.bf16.mxu0 %v1390_v8 }
  0x5d   :  { %1277 = vmatprep.mubr.bf16.mxu1 %v1391_v9 }
  0x63   :  { %1270 = vmatmul.mubr.bf16.vlgmr.msra.gmra.mrb[32].mxu0 %v1392_v10 }
  0x64   :  { %1278 = vmatmul.mubr.bf16.vlgmr.msra.gmra.mrb[32].mxu1 %v1393_v11  ;;  %1273 = vmatprep.mubr.bf16.mxu0 %v1394_v12 }
  0x65   :  { %1281 = vmatprep.mubr.bf16.mxu1 %v1395_v13 }
  0x6b   :  { %1274 = vmatmul.mubr.bf16.gmra.mrb[36].mxu0 %v1396_v14 }
  0x6c   :  { %1282 = vmatmul.mubr.bf16.gmra.mrb[36].mxu1 %v1397_v15 }
  0xf6   :  { %v1125_v16 = vpop.f32.mrb[0].mxu0 }
  0xf7   :  { %v1189_v17 = vpop.f32.mrb[0].mxu1  ;;  %v1126_v18 = vpop.f32.mrb[1].mxu0 }
  0xf8   :  { %v1127_v19 = vadd.f32 %v1126_v18, %v1125_v16  ;;  %v1190_v20 = vpop.f32.mrb[1].mxu1  ;;  %v1128_v21 = vpop.f32.mrb[2].mxu0 }
  0xf9   :  { %v1191_v22 = vadd.f32 %v1190_v20, %v1189_v17  ;;  %v1192_v23 = vpop.f32.mrb[2].mxu1  ;;  %v1129_v24 = vpop.f32.mrb[3].mxu0 }
  0xfa   :  { %v1130_v25 = vadd.f32 %v1129_v24, %v1128_v21  ;;  %v1193_v26 = vpop.f32.mrb[3].mxu1 }
  0xfb   :  { %v1194_v27 = vadd.f32 %v1193_v26, %v1192_v23  ;;  %v1658_v28 = vadd.f32 %v1191_v22, %v1127_v19 }
  0xfd   :  { %v1660_v29 = vadd.f32 %v1194_v27, %v1130_v25 }
  0xfe   :  { %v1131_v30 = vpop.f32.mrb[4].mxu0 }
  0xff   :  { %v1195_v31 = vpop.f32.mrb[4].mxu1  ;;  %v1132_v32 = vpop.f32.mrb[5].mxu0 }
 0x100   :  { %v1133_v33 = vadd.f32 %v1132_v32, %v1131_v30  ;;  %v1196_v34 = vpop.f32.mrb[5].mxu1  ;;  %v1134_v35 = vpop.f32.mrb[6].mxu0 }
 0x101   :  { %v1197_v36 = vadd.f32 %v1196_v34, %v1195_v31  ;;  %v1198_v37 = vpop.f32.mrb[6].mxu1  ;;  %v1135_v38 = vpop.f32.mrb[7].mxu0 }
 0x102   :  { %v1136_v39 = vadd.f32 %v1135_v38, %v1134_v35  ;;  %v1199_v40 = vpop.f32.mrb[7].mxu1 }
 0x103   :  { %v1200_v41 = vadd.f32 %v1199_v40, %v1198_v37  ;;  %v1662_v42 = vadd.f32 %v1197_v36, %v1133_v33 }
 0x105   :  { %v1664_v43 = vadd.f32 %v1200_v41, %v1136_v39 }
 0x106   :  { %v1137_v44 = vpop.f32.mrb[8].mxu0 }
 0x107   :  { %v1201_v45 = vpop.f32.mrb[8].mxu1  ;;  %v1138_v46 = vpop.f32.mrb[9].mxu0 }
 0x108   :  { %v1139_v47 = vadd.f32 %v1138_v46, %v1137_v44  ;;  %v1202_v48 = vpop.f32.mrb[9].mxu1  ;;  %v1140_v49 = vpop.f32.mrb[10].mxu0 }
 0x109   :  { %v1203_v50 = vadd.f32 %v1202_v48, %v1201_v45  ;;  %v1204_v51 = vpop.f32.mrb[10].mxu1  ;;  %v1141_v52 = vpop.f32.mrb[11].mxu0 }
 0x10a   :  { %v1142_v53 = vadd.f32 %v1141_v52, %v1140_v49  ;;  %v1205_v54 = vpop.f32.mrb[11].mxu1 }
 0x10b   :  { %v1206_v55 = vadd.f32 %v1205_v54, %v1204_v51  ;;  %v1666_v56 = vadd.f32 %v1203_v50, %v1139_v47 }
 0x10d   :  { %v1668_v57 = vadd.f32 %v1206_v55, %v1142_v53 }
 0x10e   :  { %v1143_v58 = vpop.f32.mrb[12].mxu0 }
 0x10f   :  { %v1207_v59 = vpop.f32.mrb[12].mxu1  ;;  %v1144_v60 = vpop.f32.mrb[13].mxu0 }
 0x110   :  { %v1145_v61 = vadd.f32 %v1144_v60, %v1143_v58  ;;  %v1208_v62 = vpop.f32.mrb[13].mxu1  ;;  %v1146_v63 = vpop.f32.mrb[14].mxu0 }
 0x111   :  { %v1209_v0 = vadd.f32 %v1208_v62, %v1207_v59  ;;  %v1210_v1 = vpop.f32.mrb[14].mxu1  ;;  %v1147_v2 = vpop.f32.mrb[15].mxu0 }
 0x112   :  { %v1148_v3 = vadd.f32 %v1147_v2, %v1146_v63  ;;  %v1211_v4 = vpop.f32.mrb[15].mxu1 }
 0x113   :  { %v1212_v5 = vadd.f32 %v1211_v4, %v1210_v1  ;;  %v1670_v6 = vadd.f32 %v1209_v0, %v1145_v61 }
 0x115   :  { %v1672_v7 = vadd.f32 %v1212_v5, %v1148_v3 }
 0x116   :  { %v1149_v8 = vpop.f32.mrb[16].mxu0 }
 0x117   :  { %v1213_v9 = vpop.f32.mrb[16].mxu1  ;;  %v1150_v10 = vpop.f32.mrb[17].mxu0 }
 0x118   :  { %v1151_v11 = vadd.f32 %v1150_v10, %v1149_v8  ;;  %v1214_v12 = vpop.f32.mrb[17].mxu1  ;;  %v1152_v13 = vpop.f32.mrb[18].mxu0 }
 0x119   :  { %v1215_v14 = vadd.f32 %v1214_v12, %v1213_v9  ;;  %v1216_v15 = vpop.f32.mrb[18].mxu1  ;;  %v1153_v16 = vpop.f32.mrb[19].mxu0  ;;  %v1682_v12 = vld [vmem:[%s1759_s2] ss:$0 sm:$0xff] }
 0x11a   :  { %v1154_v17 = vadd.f32 %v1153_v16, %v1152_v13  ;;  %v1217_v18 = vpop.f32.mrb[19].mxu1 }
 0x11b   :  { %v1218_v19 = vadd.f32 %v1217_v18, %v1216_v15  ;;  %v791_v20 = vadd.f32 %v1215_v14, %v1151_v11 }
 0x11d   :  { %v794_v21 = vadd.f32 %v1218_v19, %v1154_v17 }
 0x11e   :  { %v1155_v22 = vpop.f32.mrb[20].mxu0 }
 0x11f   :  { %v1219_v23 = vpop.f32.mrb[20].mxu1  ;;  %v1156_v24 = vpop.f32.mrb[21].mxu0 }
 0x120   :  { %v1157_v25 = vadd.f32 %v1156_v24, %v1155_v22  ;;  %v1220_v26 = vpop.f32.mrb[21].mxu1  ;;  %v1158_v27 = vpop.f32.mrb[22].mxu0 }
 0x121   :  { %v1221_v30 = vadd.f32 %v1220_v26, %v1219_v23  ;;  %v1222_v31 = vpop.f32.mrb[22].mxu1  ;;  %v1159_v32 = vpop.f32.mrb[23].mxu0 }
 0x122   :  { %v1160_v33 = vadd.f32 %v1159_v32, %v1158_v27  ;;  %v1223_v34 = vpop.f32.mrb[23].mxu1 }
 0x123   :  { %v1224_v35 = vadd.f32 %v1223_v34, %v1222_v31  ;;  %v799_v36 = vadd.f32 %v1221_v30, %v1157_v25 }
 0x125   :  { %v802_v37 = vadd.f32 %v1224_v35, %v1160_v33 }
 0x126   :  { %v1161_v38 = vpop.f32.mrb[24].mxu0 }
 0x127   :  { %v1225_v39 = vpop.f32.mrb[24].mxu1  ;;  %v1162_v40 = vpop.f32.mrb[25].mxu0 }
 0x128   :  { %v1163_v41 = vadd.f32 %v1162_v40, %v1161_v38  ;;  %v1226_v44 = vpop.f32.mrb[25].mxu1  ;;  %v1164_v45 = vpop.f32.mrb[26].mxu0 }
 0x129   :  { %v1227_v46 = vadd.f32 %v1226_v44, %v1225_v39  ;;  %v1228_v47 = vpop.f32.mrb[26].mxu1  ;;  %v1165_v48 = vpop.f32.mrb[27].mxu0 }
 0x12a   :  { %v1166_v49 = vadd.f32 %v1165_v48, %v1164_v45  ;;  %v1229_v50 = vpop.f32.mrb[27].mxu1 }
 0x12b   :  { %v1230_v51 = vadd.f32 %v1229_v50, %v1228_v47  ;;  %v1674_v52 = vadd.f32 %v1227_v46, %v1163_v41 }
 0x12d   :  { %v1676_v53 = vadd.f32 %v1230_v51, %v1166_v49 }
 0x12e   :  { %v1167_v54 = vpop.f32.mrb[28].mxu0 }
 0x12f   :  { %v1231_v55 = vpop.f32.mrb[28].mxu1  ;;  %v1168_v58 = vpop.f32.mrb[29].mxu0 }
 0x130   :  { %v1169_v59 = vadd.f32 %v1168_v58, %v1167_v54  ;;  %v1232_v60 = vpop.f32.mrb[29].mxu1  ;;  %v1170_v61 = vpop.f32.mrb[30].mxu0 }
 0x131   :  { %v1233_v62 = vadd.f32 %v1232_v60, %v1231_v55  ;;  %v1234_v63 = vpop.f32.mrb[30].mxu1  ;;  %v1171_v0 = vpop.f32.mrb[31].mxu0 }
 0x132   :  { %v1172_v1 = vadd.f32 %v1171_v0, %v1170_v61  ;;  %v1235_v2 = vpop.f32.mrb[31].mxu1 }
 0x133   :  { %v1236_v3 = vadd.f32 %v1235_v2, %v1234_v63  ;;  %v815_v4 = vadd.f32 %v1233_v62, %v1169_v59 }
 0x135   :  { %v818_v5 = vadd.f32 %v1236_v3, %v1172_v1 }
 0x136   :  { %v1271_v8 = vpop.f32.mrb[32].mxu0 }
 0x137   :  { %v864_v9 = vadd.f32 %v1271_v8, %v1662_v42  ;;  %v1279_v10 = vpop.f32.mrb[32].mxu1  ;;  %v855_v11 = vpop.f32.mrb[33].mxu0 }
 0x138   :  { %v896_v13 = vadd.f32 %v1279_v10, %v799_v36  ;;  %v856_v14 = vadd.f32 %v855_v11, %v1658_v28  ;;  %v887_v15 = vpop.f32.mrb[33].mxu1  ;;  %v1272_v16 = vpop.f32.mrb[34].mxu0 }
 0x139   :  { %v888_v17 = vadd.f32 %v887_v15, %v791_v20  ;;  %v867_v18 = vadd.f32 %v1272_v16, %v1664_v43  ;;  %v1280_v19 = vpop.f32.mrb[34].mxu1  ;;  %v858_v22 = vpop.f32.mrb[35].mxu0  ;;  %v978_v25 = vadd.f32 %v1682_v12, %v864_v9 }
 0x13a   :  { %v899_v23 = vadd.f32 %v1280_v19, %v802_v37  ;;  %v859_v42 = vadd.f32 %v858_v22, %v1660_v29  ;;  %v890_v24 = vpop.f32.mrb[35].mxu1  ;;  %v986_v27 = vadd.f32 %v1682_v12, %v896_v13  ;;  %v976_v30 = vadd.f32 %v1682_v12, %v856_v14 }
 0x13b   :  { %v891_v26 = vadd.f32 %v890_v24, %v794_v21  ;;  %v994_v31 = vmax.f32 %v978_v25, 0.0  ;;  %v984_v28 = vadd.f32 %v1682_v12, %v888_v17  ;;  %v979_v20 = vadd.f32 %v1682_v12, %v867_v18 }
 0x13c   :  { %v1002_v32 = vmax.f32 %v986_v27, 0.0  ;;  %v992_v43 = vmax.f32 %v976_v30, 0.0  ;;  %v987_v33 = vadd.f32 %v1682_v12, %v899_v23  ;;  %v977_v34 = vadd.f32 %v1682_v12, %v859_v42 }
 0x13d   :  { %1010 = vst [vmem:[%s1760_s3 + $0x10] sm:$0xff] %v994_v31  ;;  %v1000_v21 = vmax.f32 %v984_v28, 0.0  ;;  %v995_v35 = vmax.f32 %v979_v20, 0.0  ;;  %v985_v36 = vadd.f32 %v1682_v12, %v891_v26 }
 0x13e   :  { %v1275_v29 = vpop.f32.mrb[36].mxu0  ;;  %1018 = vst [vmem:[%s1760_s3 + $0x50] sm:$0xff] %v1002_v32  ;;  %1008 = vst [vmem:[%s1760_s3] sm:$0xff] %v992_v43  ;;  %v1003_v40 = vmax.f32 %v987_v33, 0.0  ;;  %v993_v41 = vmax.f32 %v977_v34, 0.0 }
 0x13f   :  { %v880_v37 = vadd.f32 %v1275_v29, %v1670_v6  ;;  %v1283_v38 = vpop.f32.mrb[36].mxu1  ;;  %v871_v39 = vpop.f32.mrb[37].mxu0  ;;  %1016 = vst [vmem:[%s1760_s3 + $0x40] sm:$0xff] %v1000_v21  ;;  %1011 = vst [vmem:[%s1760_s3 + $0x18] sm:$0xff] %v995_v35  ;;  %v1001_v6 = vmax.f32 %v985_v36, 0.0 }
 0x140   :  { %v912_v44 = vadd.f32 %v1283_v38, %v815_v4  ;;  %v872_v45 = vadd.f32 %v871_v39, %v1666_v56  ;;  %v903_v46 = vpop.f32.mrb[37].mxu1  ;;  %v1276_v47 = vpop.f32.mrb[38].mxu0  ;;  %1019 = vst [vmem:[%s1760_s3 + $0x58] sm:$0xff] %v1003_v40  ;;  %1009 = vst [vmem:[%s1760_s3 + $0x8] sm:$0xff] %v993_v41 }
 0x141   :  { %v904_v48 = vadd.f32 %v903_v46, %v1674_v52  ;;  %v883_v49 = vadd.f32 %v1276_v47, %v1672_v7  ;;  %v1284_v50 = vpop.f32.mrb[38].mxu1  ;;  %v874_v51 = vpop.f32.mrb[39].mxu0  ;;  %1017 = vst [vmem:[%s1760_s3 + $0x48] sm:$0xff] %v1001_v6  ;;  %v982_v7 = vadd.f32 %v1682_v12, %v880_v37 }
 0x142   :  { %v915_v56 = vadd.f32 %v1284_v50, %v818_v5  ;;  %v875_v54 = vadd.f32 %v874_v51, %v1668_v57  ;;  %v906_v55 = vpop.f32.mrb[39].mxu1  ;;  %v990_v58 = vadd.f32 %v1682_v12, %v912_v44  ;;  %v980_v59 = vadd.f32 %v1682_v12, %v872_v45 }
 0x143   :  { %v907_v52 = vadd.f32 %v906_v55, %v1676_v53  ;;  %v998_v60 = vmax.f32 %v982_v7, 0.0  ;;  %v988_v61 = vadd.f32 %v1682_v12, %v904_v48  ;;  %v983_v62 = vadd.f32 %v1682_v12, %v883_v49 }
 0x144   :  { %v1006_v63 = vmax.f32 %v990_v58, 0.0  ;;  %v996_v57 = vmax.f32 %v980_v59, 0.0  ;;  %v991_v0 = vadd.f32 %v1682_v12, %v915_v56  ;;  %v981_v1 = vadd.f32 %v1682_v12, %v875_v54 }
 0x145   :  { %1014 = vst [vmem:[%s1760_s3 + $0x30] sm:$0xff] %v998_v60  ;;  %v1004_v53 = vmax.f32 %v988_v61, 0.0  ;;  %v999_v2 = vmax.f32 %v983_v62, 0.0  ;;  %v989_v3 = vadd.f32 %v1682_v12, %v907_v52 }
 0x146   :  { %1022 = vst [vmem:[%s1760_s3 + $0x70] sm:$0xff] %v1006_v63  ;;  %1012 = vst [vmem:[%s1760_s3 + $0x20] sm:$0xff] %v996_v57  ;;  %v1007_v4 = vmax.f32 %v991_v0, 0.0  ;;  %v997_v5 = vmax.f32 %v981_v1, 0.0 }
 0x147   :  { %1020 = vst [vmem:[%s1760_s3 + $0x60] sm:$0xff] %v1004_v53  ;;  %1015 = vst [vmem:[%s1760_s3 + $0x38] sm:$0xff] %v999_v2  ;;  %v1005_v8 = vmax.f32 %v989_v3, 0.0 }
 0x148   :  { %1023 = vst [vmem:[%s1760_s3 + $0x78] sm:$0xff] %v1007_v4  ;;  %1013 = vst [vmem:[%s1760_s3 + $0x28] sm:$0xff] %v997_v5 }
 0x149   :  { %1021 = vst [vmem:[%s1760_s3 + $0x68] sm:$0xff] %v1005_v8 }

// kernel: acrlsd_forward.12
= control target key start
LH: loop header
LB: loop body
LE: loop exit
PB: predicated region body
PF: predicated region fallthrough
CT: control target
= control target key end

     0   :  { %s603_s1 = inlined_call_operand.vmem [shape: bf16[128,128], index: 1, kind: input, shape index: {}]   ;;  %s604_s0 = inlined_call_operand.vmem [shape: bf16[128,128], index: 0, kind: input, shape index: {}]   ;;  %s605_s2 = inlined_call_operand.vmem [shape: f32[1,128], index: 2, kind: input, shape index: {}]   ;;  %s606_s3 = inlined_call_operand.vmem [shape: f32[128,128], index: 3, kind: output, shape index: {}]  }
   0x1   :  { %v468_v0 = vld [vmem:[%s603_s1] sm:$0xff]   ;;  %v469_v1 = vld [vmem:[%s603_s1 + $0x8] sm:$0xff]   ;;  %v470_v2 = vld [vmem:[%s603_s1 + $0x10] sm:$0xff]  }
   0x2   :  { %419 = vmatprep.subr.bf16.mxu0 %v468_v0  ;;  %451 = vmatprep.subr.bf16.mxu1 %v468_v0  ;;  %v471_v3 = vld [vmem:[%s603_s1 + $0x18] sm:$0xff]   ;;  %v476_v4 = vld [vmem:[%s604_s0] sm:$0xff]   ;;  %v473_v7 = vld [vmem:[%s603_s1 + $0x28] sm:$0xff]  }
   0x3   :  { %420 = vmatpush3.bf16.msra.mxu0 %v468_v0  ;;  %459 = vmatpush3.bf16.msra.mxu1 %v468_v0  ;;  %v477_v5 = vld [vmem:[%s604_s0 + $0x20] sm:$0xff]   ;;  %v474_v8 = vld [vmem:[%s603_s1 + $0x30] sm:$0xff]   ;;  %v475_v9 = vld [vmem:[%s603_s1 + $0x38] sm:$0xff]  }
   0x4   :  { %421 = vmatprep.subr.bf16.mxu0 %v469_v1  ;;  %452 = vmatprep.subr.bf16.mxu1 %v469_v1  ;;  %v472_v6 = vld [vmem:[%s603_s1 + $0x20] sm:$0xff]   ;;  %v478_v10 = vld [vmem:[%s604_s0 + $0x8] sm:$0xff]   ;;  %v480_v12 = vld [vmem:[%s604_s0 + $0x10] sm:$0xff]  }
   0x5   :  { %435 = vmatprep.mubr.bf16.mxu0 %v476_v4  ;;  %443 = vmatprep.mubr.bf16.mxu1 %v477_v5  ;;  %v479_v11 = vld [vmem:[%s604_s0 + $0x28] sm:$0xff]   ;;  %v481_v13 = vld [vmem:[%s604_s0 + $0x30] sm:$0xff]   ;;  %v482_v14 = vld [vmem:[%s604_s0 + $0x18] sm:$0xff]  }
   0x6   :  { %v483_v15 = vld [vmem:[%s604_s0 + $0x38] sm:$0xff]   ;;  %v402_v17 = vld [vmem:[%s605_s2] ss:$0 sm:$0xff] }
   0x7   :  { %422 = vmatpush3.bf16.msra.mxu0 %v469_v1  ;;  %460 = vmatpush3.bf16.msra.mxu1 %v469_v1 }
   0x8   :  { %423 = vmatprep.subr.bf16.mxu0 %v470_v2  ;;  %453 = vmatprep.subr.bf16.mxu1 %v470_v2 }
   0xb   :  { %424 = vmatpush3.bf16.msra.mxu0 %v470_v2  ;;  %461 = vmatpush3.bf16.msra.mxu1 %v470_v2 }
   0xc   :  { %425 = vmatprep.subr.bf16.mxu0 %v471_v3  ;;  %454 = vmatprep.subr.bf16.mxu1 %v471_v3 }
   0xf   :  { %426 = vmatpush3.bf16.msra.mxu0 %v471_v3  ;;  %462 = vmatpush3.bf16.msra.mxu1 %v471_v3 }
  0x10   :  { %427 = vmatprep.subr.bf16.mxu0 %v472_v6  ;;  %455 = vmatprep.subr.bf16.mxu1 %v472_v6 }
  0x13   :  { %428 = vmatpush3.bf16.msra.mxu0 %v472_v6  ;;  %463 = vmatpush3.bf16.msra.mxu1 %v472_v6 }
  0x14   :  { %429 = vmatprep.subr.bf16.mxu0 %v473_v7  ;;  %456 = vmatprep.subr.bf16.mxu1 %v473_v7 }
  0x17   :  { %430 = vmatpush3.bf16.msra.mxu0 %v473_v7  ;;  %464 = vmatpush3.bf16.msra.mxu1 %v473_v7 }
  0x18   :  { %431 = vmatprep.subr.bf16.mxu0 %v474_v8  ;;  %457 = vmatprep.subr.bf16.mxu1 %v474_v8 }
  0x1b   :  { %432 = vmatpush3.bf16.msra.mxu0 %v474_v8  ;;  %465 = vmatpush3.bf16.msra.mxu1 %v474_v8 }
  0x1c   :  { %433 = vmatprep.subr.bf16.mxu0 %v475_v9  ;;  %458 = vmatprep.subr.bf16.mxu1 %v475_v9 }
  0x1f   :  { %434 = vmatpush3.bf16.msra.mxu0 %v475_v9  ;;  %466 = vmatpush3.bf16.msra.mxu1 %v475_v9 }
  0x22   :  { %436 = vmatmul.mubr.bf16.vlgmr.msra.gmra.mrb[0].mxu0 %v478_v10  ;;  %444 = vmatmul.mubr.bf16.vlgmr.msra.gmra.mrb[0].mxu1 %v479_v11 }
  0x23   :  { %439 = vmatprep.mubr.bf16.mxu0 %v480_v12  ;;  %447 = vmatprep.mubr.bf16.mxu1 %v481_v13 }
  0x2a   :  { %440 = vmatmul.mubr.bf16.gmra.mrb[4].mxu0 %v482_v14  ;;  %448 = vmatmul.mubr.bf16.gmra.mrb[4].mxu1 %v483_v15 }
  0xf5   :  { %v437_v16 = vpop.f32.mrb[0].mxu0  ;;  %v445_v18 = vpop.f32.mrb[0].mxu1 }
  0xf6   :  { %v213_v19 = vpop.f32.mrb[1].mxu0  ;;  %v245_v20 = vpop.f32.mrb[1].mxu1  ;;  %v336_v23 = vadd.f32 %v437_v16, %v402_v17  ;;  %v344_v24 = vadd.f32 %v445_v18, %v402_v17 }
  0xf7   :  { %v438_v21 = vpop.f32.mrb[2].mxu0  ;;  %v446_v22 = vpop.f32.mrb[2].mxu1  ;;  %v334_v27 = vadd.f32 %v402_v17, %v213_v19  ;;  %v342_v28 = vadd.f32 %v402_v17, %v245_v20 }
  0xf8   :  { %v216_v25 = vpop.f32.mrb[3].mxu0  ;;  %v248_v26 = vpop.f32.mrb[3].mxu1  ;;  %v352_v29 = vmax.f32 %v336_v23, 0.0  ;;  %v360_v30 = vmax.f32 %v344_v24, 0.0  ;;  %v337_v31 = vadd.f32 %v438_v21, %v402_v17  ;;  %v345_v32 = vadd.f32 %v446_v22, %v402_v17 }
  0xf9   :  { %v350_v33 = vmax.f32 %v334_v27, 0.0  ;;  %v358_v34 = vmax.f32 %v342_v28, 0.0  ;;  %v335_v35 = vadd.f32 %v402_v17, %v216_v25  ;;  %v343_v36 = vadd.f32 %v402_v17, %v248_v26 }
  0xfa   :  { %368 = vst [vmem:[%s606_s3 + $0x10] sm:$0xff] %v352_v29  ;;  %376 = vst [vmem:[%s606_s3 + $0x50] sm:$0xff] %v360_v30  ;;  %v353_v37 = vmax.f32 %v337_v31, 0.0  ;;  %v361_v38 = vmax.f32 %v345_v32, 0.0 }
  0xfb   :  { %366 = vst [vmem:[%s606_s3] sm:$0xff] %v350_v33  ;;  %374 = vst [vmem:[%s606_s3 + $0x40] sm:$0xff] %v358_v34  ;;  %v351_v39 = vmax.f32 %v335_v35, 0.0  ;;  %v359_v40 = vmax.f32 %v343_v36, 0.0 }
  0xfc   :  { %369 = vst [vmem:[%s606_s3 + $0x18] sm:$0xff] %v353_v37  ;;  %377 = vst [vmem:[%s606_s3 + $0x58] sm:$0xff] %v361_v38 }
  0xfd   :  { %v441_v41 = vpop.f32.mrb[4].mxu0  ;;  %v449_v42 = vpop.f32.mrb[4].mxu1  ;;  %367 = vst [vmem:[%s606_s3 + $0x8] sm:$0xff] %v351_v39  ;;  %375 = vst [vmem:[%s606_s3 + $0x48] sm:$0xff] %v359_v40 }
  0xfe   :  { %v229_v43 = vpop.f32.mrb[5].mxu0  ;;  %v261_v44 = vpop.f32.mrb[5].mxu1  ;;  %v340_v47 = vadd.f32 %v441_v41, %v402_v17  ;;  %v348_v48 = vadd.f32 %v449_v42, %v402_v17 }
  0xff   :  { %v442_v45 = vpop.f32.mrb[6].mxu0  ;;  %v450_v46 = vpop.f32.mrb[6].mxu1  ;;  %v338_v51 = vadd.f32 %v402_v17, %v229_v43  ;;  %v346_v52 = vadd.f32 %v402_v17, %v261_v44 }
 0x100   :  { %v232_v49 = vpop.f32.mrb[7].mxu0  ;;  %v264_v50 = vpop.f32.mrb[7].mxu1  ;;  %v356_v53 = vmax.f32 %v340_v47, 0.0  ;;  %v364_v54 = vmax.f32 %v348_v48, 0.0  ;;  %v341_v55 = vadd.f32 %v442_v45, %v402_v17  ;;  %v349_v56 = vadd.f32 %v450_v46, %v402_v17 }
 0x101   :  { %v354_v57 = vmax.f32 %v338_v51, 0.0  ;;  %v362_v58 = vmax.f32 %v346_v52, 0.0  ;;  %v339_v59 = vadd.f32 %v402_v17, %v232_v49  ;;  %v347_v60 = vadd.f32 %v402_v17, %v264_v50 }
 0x102   :  { %372 = vst [vmem:[%s606_s3 + $0x30] sm:$0xff] %v356_v53  ;;  %380 = vst [vmem:[%s606_s3 + $0x70] sm:$0xff] %v364_v54  ;;  %v357_v61 = vmax.f32 %v341_v55, 0.0  ;;  %v365_v62 = vmax.f32 %v349_v56, 0.0 }
 0x103   :  { %370 = vst [vmem:[%s606_s3 + $0x20] sm:$0xff] %v354_v57  ;;  %378 = vst [vmem:[%s606_s3 + $0x60] sm:$0xff] %v362_v58  ;;  %v355_v63 = vmax.f32 %v339_v59, 0.0  ;;  %v363_v0 = vmax.f32 %v347_v60, 0.0 }
 0x104   :  { %373 = vst [vmem:[%s606_s3 + $0x38] sm:$0xff] %v357_v61  ;;  %381 = vst [vmem:[%s606_s3 + $0x78] sm:$0xff] %v365_v62 }
 0x105   :  { %371 = vst [vmem:[%s606_s3 + $0x28] sm:$0xff] %v355_v63  ;;  %379 = vst [vmem:[%s606_s3 + $0x68] sm:$0xff] %v363_v0 }

</bundles_post_ra>
